<compile_context>
chip_gen: v7x
topology: tpu7x:2x2x1
jax: 0.10.0
libtpu: 0.0.40
codegen_flags: <defaults>
</compile_context>

<pallas_src>
import math

import jax
import jax.numpy as jnp
from jax.experimental import pallas as pl
from jax.experimental.pallas import tpu as pltpu

# ---- small synthetic config ----
B = 2        # batch
S = 16       # subword sequence length
T = 8        # number of word positions gathered (subword_tokens_index)
V = 32       # vocab size
H = 32       # pretrained-encoder hidden size
NH = 2       # attention heads
DH = H // NH # head dim
F = 64       # FFN inner size
O = 32       # args.ptm_output_size (PretrainedEncoder projection size)

BW = 3 * H   # packed-bias row width (widest vector is bqkv)
# packed bias row ids
R_BQKV, R_BO, R_B1, R_B2, R_BP, R_LN1G, R_LN1B, R_LN2G, R_LN2B = range(9)
NB = 9


def _gelu(x):
    # TODO(synk): PyTorch nn.GELU default is the exact erf form; we use the
    # tanh approximation (EUP-friendly), differences are ~1e-3.
    return 0.5 * x * (1.0 + jnp.tanh(0.7978845608028654 * (x + 0.044715 * x * x * x)))


def _layer_norm(x, g, b, eps=1e-12):
    mu = jnp.mean(x, axis=-1, keepdims=True)
    var = jnp.mean((x - mu) ** 2, axis=-1, keepdims=True)
    return (x - mu) * jax.lax.rsqrt(var + eps) * g + b


def _make_encoder_kernel(want_attn):
    """One transformer layer + GELU projection + fused index-select gather.

    Whole batch handled in a single invocation (activations flattened to
    (B*S, H)); attention is statically unrolled over (batch, head).
    """

    def kernel(x_ref, idxT_ref, wqkv_ref, wo_ref, w1_ref, w2_ref, wp_ref,
               bias_ref, *out_and_scratch):
        if want_attn:
            seq_ref, gat_ref, hid_ref, attn_ref, ctx_scr = out_and_scratch
        else:
            seq_ref, gat_ref, hid_ref, ctx_scr = out_and_scratch
            attn_ref = None

        x = x_ref[...]                                   # (B*S, H)
        bias = bias_ref[...]                             # (NB, BW) packed vectors
        bqkv = bias[R_BQKV:R_BQKV + 1, 0:3 * H]          # (1, 3H)
        bo = bias[R_BO:R_BO + 1, 0:H]
        b1 = bias[R_B1:R_B1 + 1, 0:F]
        b2 = bias[R_B2:R_B2 + 1, 0:H]
        bp = bias[R_BP:R_BP + 1, 0:O]
        ln1g = bias[R_LN1G:R_LN1G + 1, 0:H]
        ln1b = bias[R_LN1B:R_LN1B + 1, 0:H]
        ln2g = bias[R_LN2G:R_LN2G + 1, 0:H]
        ln2b = bias[R_LN2B:R_LN2B + 1, 0:H]

        # fused QKV over the whole flattened batch; Q columns of wqkv/bqkv are
        # pre-scaled by 1/sqrt(DH) in the wrapper (trace time).
        qkv = jnp.dot(x, wqkv_ref[...], preferred_element_type=jnp.float32) + bqkv
        wo = wo_ref[...]                                 # (H, H)

        for b in range(B):                               # static unroll
            rows = slice(b * S, (b + 1) * S)
            q = qkv[rows, 0:H]
            k = qkv[rows, H:2 * H]
            v = qkv[rows, 2 * H:3 * H]
            ctx_b = None
            for h in range(NH):                          # static unroll
                cols = slice(h * DH, (h + 1) * DH)
                s = jnp.dot(q[:, cols], k[:, cols].T,
                            preferred_element_type=jnp.float32)       # (S, S)
                s = s - jnp.max(s, axis=-1, keepdims=True)
                p = jnp.exp(s)
                p = p * pl.reciprocal(jnp.sum(p, axis=-1, keepdims=True),
                                      approx=True)
                if want_attn:
                    attn_ref[b, h, :, :] = p             # attention probs
                head_ctx = jnp.dot(p, v[:, cols],
                                   preferred_element_type=jnp.float32)  # (S, DH)
                # fold the per-head slice of the output projection here so the
                # scratch is written with full-lane-width rows only.
                contrib = jnp.dot(head_ctx, wo[cols, :],
                                  preferred_element_type=jnp.float32)   # (S, H)
                ctx_b = contrib if ctx_b is None else ctx_b + contrib
            ctx_scr[rows, :] = ctx_b                     # sublane-aligned block

        h1 = _layer_norm(x + ctx_scr[...] + bo, ln1g, ln1b)

        ff = _gelu(jnp.dot(h1, w1_ref[...], preferred_element_type=jnp.float32) + b1)
        ff = jnp.dot(ff, w2_ref[...], preferred_element_type=jnp.float32) + b2
        h2 = _layer_norm(h1 + ff, ln2g, ln2b)            # last hidden, (B*S, H)
        hid_ref[...] = h2

        proj = _gelu(jnp.dot(h2, wp_ref[...], preferred_element_type=jnp.float32) + bp)
        seq_ref[...] = proj                              # (B*S, O)

        # fused batched_index_select: one-hot(idx) @ proj on the MXU.
        iota_s = jax.lax.broadcasted_iota(jnp.int32, (T, S), 1)
        idxT = idxT_ref[...]                             # (T, B) int32
        for b in range(B):                               # static unroll
            one_hot = (iota_s == idxT[:, b:b + 1]).astype(jnp.float32)  # (T, S)
            gat_ref[b, :, :] = jnp.dot(one_hot, proj[b * S:(b + 1) * S, :],
                                       preferred_element_type=jnp.float32)

    return kernel


def pretrained_encoder_with_gather(x_emb_flat, idxT, params, want_attn):
    """Single pallas_call: encoder + projection + fused gather."""
    # Fold the attention scale into the Q columns of wqkv / bqkv (trace time).
    scale = 1.0 / math.sqrt(DH)
    wqkv = params["wqkv"].at[:, :H].multiply(scale)
    bqkv = params["bqkv"].at[:H].multiply(scale)

    def row(v):
        return jnp.pad(v, (0, BW - v.shape[0]))

    bias_pack = jnp.stack([
        row(bqkv), row(params["bo"]), row(params["b1"]), row(params["b2"]),
        row(params["bp"]), row(params["ln1_g"]), row(params["ln1_b"]),
        row(params["ln2_g"]), row(params["ln2_b"]),
    ])                                                   # (NB, BW)

    inputs = (x_emb_flat, idxT, wqkv, params["wo"], params["w1"],
              params["w2"], params["wp"], bias_pack)

    out_shapes = [
        jax.ShapeDtypeStruct((B * S, O), jnp.float32),   # projected seq repr
        jax.ShapeDtypeStruct((B, T, O), jnp.float32),    # gathered token reprs
        jax.ShapeDtypeStruct((B * S, H), jnp.float32),   # last hidden state
    ]
    if want_attn:
        out_shapes.append(jax.ShapeDtypeStruct((B, NH, S, S), jnp.float32))

    return pl.pallas_call(
        _make_encoder_kernel(want_attn),
        out_shape=tuple(out_shapes),
        in_specs=[pl.BlockSpec(memory_space=pltpu.MemorySpace.VMEM)
                  for _ in inputs],
        out_specs=tuple(pl.BlockSpec(memory_space=pltpu.MemorySpace.VMEM)
                        for _ in out_shapes),
        scratch_shapes=[pltpu.VMEM((B * S, H), jnp.float32)],   # ctx scratch
    )(*inputs)


def pretrained_embed_model_forward(batch_inputs, params):
    """Mirrors PretrainedEmbedModel.forward (mutates batch_inputs dict)."""
    tokens = batch_inputs["subword_tokens"]
    # Embedding lookup glue: token + (optional) segment + position embeddings.
    x_emb = params["tok_emb"][tokens] + params["pos_emb"][None, :, :]
    has_seg = "subword_segment_ids" in batch_inputs
    if has_seg:
        x_emb = x_emb + params["seg_emb"][batch_inputs["subword_segment_ids"]]
    x_emb_flat = x_emb.reshape(B * S, H).astype(jnp.float32)

    # indices transposed so each batch's index column lives on sublanes.
    idxT = batch_inputs["subword_tokens_index"].astype(jnp.int32).T   # (T, B)

    outs = pretrained_encoder_with_gather(x_emb_flat, idxT, params,
                                          want_attn=has_seg)
    if has_seg:
        seq_flat, gathered, hid_flat, attns = outs
        batch_inputs["batch_pretrained_attentions"] = attns
    else:
        seq_flat, gathered, hid_flat = outs

    seq_repr = seq_flat.reshape(B, S, O)
    batch_inputs["batch_pretrained_hidden_states"] = hid_flat.reshape(B, S, H)
    batch_inputs["seq_encoder_reprs"] = gathered                      # (B, T, O)
    # CLS = projected row 0 (wrapper-side slice is free).
    # TODO(synk): if the real PretrainedEncoder uses a BERT pooler
    # (tanh(W·h0+b)) for the CLS repr, apply it here instead.
    batch_inputs["seq_cls_repr"] = seq_repr[:, 0, :]                  # (B, O)
    return batch_inputs


if __name__ == "__main__":
    key = jax.random.PRNGKey(0)
    keys = jax.random.split(key, 12)

    def nrm(k, shape):
        return jax.random.normal(k, shape, jnp.float32) * 0.02

    params = {
        # embedding tables (glue)
        "tok_emb": nrm(keys[0], (V, H)),
        "seg_emb": nrm(keys[1], (2, H)),
        "pos_emb": nrm(keys[2], (S, H)),
        # transformer layer
        "wqkv": nrm(keys[3], (H, 3 * H)),
        "bqkv": jnp.zeros((3 * H,), jnp.float32),
        "wo": nrm(keys[4], (H, H)),
        "bo": jnp.zeros((H,), jnp.float32),
        "ln1_g": jnp.ones((H,), jnp.float32),
        "ln1_b": jnp.zeros((H,), jnp.float32),
        "w1": nrm(keys[5], (H, F)),
        "b1": jnp.zeros((F,), jnp.float32),
        "w2": nrm(keys[6], (F, H)),
        "b2": jnp.zeros((H,), jnp.float32),
        "ln2_g": jnp.ones((H,), jnp.float32),
        "ln2_b": jnp.zeros((H,), jnp.float32),
        # output projection (args.ptm_output_size) with GELU activation
        "wp": nrm(keys[7], (H, O)),
        "bp": jnp.zeros((O,), jnp.float32),
    }

    batch_inputs = {
        "subword_tokens": jax.random.randint(keys[8], (B, S), 0, V).astype(jnp.int32),
        "subword_segment_ids": jnp.concatenate(
            [jnp.zeros((B, S // 2), jnp.int32), jnp.ones((B, S - S // 2), jnp.int32)],
            axis=1),
        "subword_tokens_index": jax.random.randint(keys[9], (B, T), 1, S).astype(jnp.int32),
    }

    out = pretrained_embed_model_forward(batch_inputs, params)
    jax.block_until_ready(out["seq_encoder_reprs"])
    jax.block_until_ready(out["seq_cls_repr"])
    jax.block_until_ready(out["batch_pretrained_hidden_states"])
    jax.block_until_ready(out["batch_pretrained_attentions"])

    assert out["seq_encoder_reprs"].shape == (B, T, O)
    assert out["seq_cls_repr"].shape == (B, O)
    assert out["batch_pretrained_hidden_states"].shape == (B, S, H)
    assert out["batch_pretrained_attentions"].shape == (B, NH, S, S)
    print("KERNEL_OK")
</pallas_src>

<mosaic_0001>
module attributes {stable_mosaic.version = 11 : i64} {
  func.func @kernel(%arg0: memref<32x32xf32, #tpu.memory_space<vmem>>, %arg1: memref<8x2xi32, #tpu.memory_space<vmem>>, %arg2: memref<32x96xf32, #tpu.memory_space<vmem>>, %arg3: memref<32x32xf32, #tpu.memory_space<vmem>>, %arg4: memref<32x64xf32, #tpu.memory_space<vmem>>, %arg5: memref<64x32xf32, #tpu.memory_space<vmem>>, %arg6: memref<32x32xf32, #tpu.memory_space<vmem>>, %arg7: memref<9x96xf32, #tpu.memory_space<vmem>>, %arg8: memref<32x32xf32, #tpu.memory_space<vmem>>, %arg9: memref<2x8x32xf32, #tpu.memory_space<vmem>>, %arg10: memref<32x32xf32, #tpu.memory_space<vmem>>, %arg11: memref<2x2x16x16xf32, #tpu.memory_space<vmem>>, %arg12: memref<32x32xf32, #tpu.memory_space<vmem>>) attributes {dimension_semantics = [], scalar_prefetch = 0 : i64, scratch_operands = 1 : i64, tpu.core_type = #tpu.core_type<tc>} {
    %c0 = arith.constant 0 : index
    %c0_0 = arith.constant 0 : index
    %0 = vector.load %arg0[%c0, %c0_0] : memref<32x32xf32, #tpu.memory_space<vmem>>, vector<32x32xf32>
    %c0_1 = arith.constant 0 : index
    %c0_2 = arith.constant 0 : index
    %1 = vector.load %arg7[%c0_1, %c0_2] : memref<9x96xf32, #tpu.memory_space<vmem>>, vector<9x96xf32>
    %2 = vector.extract_strided_slice %1 {offsets = [0, 0], sizes = [1, 96], strides = [1, 1]} : vector<9x96xf32> to vector<1x96xf32>
    %3 = vector.extract_strided_slice %1 {offsets = [1, 0], sizes = [1, 32], strides = [1, 1]} : vector<9x96xf32> to vector<1x32xf32>
    %4 = vector.extract_strided_slice %1 {offsets = [2, 0], sizes = [1, 64], strides = [1, 1]} : vector<9x96xf32> to vector<1x64xf32>
    %5 = vector.extract_strided_slice %1 {offsets = [3, 0], sizes = [1, 32], strides = [1, 1]} : vector<9x96xf32> to vector<1x32xf32>
    %6 = vector.extract_strided_slice %1 {offsets = [4, 0], sizes = [1, 32], strides = [1, 1]} : vector<9x96xf32> to vector<1x32xf32>
    %7 = vector.extract_strided_slice %1 {offsets = [5, 0], sizes = [1, 32], strides = [1, 1]} : vector<9x96xf32> to vector<1x32xf32>
    %8 = vector.extract_strided_slice %1 {offsets = [6, 0], sizes = [1, 32], strides = [1, 1]} : vector<9x96xf32> to vector<1x32xf32>
    %9 = vector.extract_strided_slice %1 {offsets = [7, 0], sizes = [1, 32], strides = [1, 1]} : vector<9x96xf32> to vector<1x32xf32>
    %10 = vector.extract_strided_slice %1 {offsets = [8, 0], sizes = [1, 32], strides = [1, 1]} : vector<9x96xf32> to vector<1x32xf32>
    %c0_3 = arith.constant 0 : index
    %c0_4 = arith.constant 0 : index
    %11 = vector.load %arg2[%c0_3, %c0_4] : memref<32x96xf32, #tpu.memory_space<vmem>>, vector<32x96xf32>
    %cst = arith.constant dense<0.000000e+00> : vector<32x96xf32>
    %12 = tpu.matmul %0, %11, %cst {dimension_numbers = #tpu.dot_dimension_numbers<[1], [0], [0], [1], [0, 0, 1, 1], [], []>} : vector<32x32xf32>, vector<32x96xf32>, vector<32x96xf32> -> vector<32x96xf32>
    %13 = vector.broadcast %2 : vector<1x96xf32> to vector<32x96xf32>
    %14 = arith.addf %12, %13 : vector<32x96xf32>
    %c0_5 = arith.constant 0 : index
    %c0_6 = arith.constant 0 : index
    %15 = vector.load %arg3[%c0_5, %c0_6] : memref<32x32xf32, #tpu.memory_space<vmem>>, vector<32x32xf32>
    %16 = vector.extract_strided_slice %14 {offsets = [0, 0], sizes = [16, 32], strides = [1, 1]} : vector<32x96xf32> to vector<16x32xf32>
    %17 = vector.extract_strided_slice %14 {offsets = [0, 32], sizes = [16, 32], strides = [1, 1]} : vector<32x96xf32> to vector<16x32xf32>
    %18 = vector.extract_strided_slice %14 {offsets = [0, 64], sizes = [16, 32], strides = [1, 1]} : vector<32x96xf32> to vector<16x32xf32>
    %19 = vector.extract_strided_slice %16 {offsets = [0, 0], sizes = [16, 16], strides = [1, 1]} : vector<16x32xf32> to vector<16x16xf32>
    %20 = vector.extract_strided_slice %17 {offsets = [0, 0], sizes = [16, 16], strides = [1, 1]} : vector<16x32xf32> to vector<16x16xf32>
    %21 = tpu.transpose %20, [1, 0] : vector<16x16xf32> -> vector<16x16xf32>
    %cst_7 = arith.constant dense<0.000000e+00> : vector<16x16xf32>
    %22 = tpu.matmul %19, %21, %cst_7 {dimension_numbers = #tpu.dot_dimension_numbers<[1], [0], [0], [1], [0, 0, 1, 1], [], []>} : vector<16x16xf32>, vector<16x16xf32>, vector<16x16xf32> -> vector<16x16xf32>
    %cst_8 = arith.constant dense<0xFF800000> : vector<16xf32>
    %23 = vector.multi_reduction <maximumf>, %22, %cst_8 [1] : vector<16x16xf32> to vector<16xf32>
    %24 = vector.shape_cast %23 : vector<16xf32> to vector<16x1xf32>
    %25 = vector.broadcast %24 : vector<16x1xf32> to vector<16x16xf32>
    %26 = arith.subf %22, %25 : vector<16x16xf32>
    %27 = math.exp %26 : vector<16x16xf32>
    %cst_9 = arith.constant dense<0.000000e+00> : vector<16xf32>
    %28 = vector.multi_reduction <add>, %27, %cst_9 [1] : vector<16x16xf32> to vector<16xf32>
    %29 = vector.shape_cast %28 : vector<16xf32> to vector<16x1xf32>
    %30 = tpu.reciprocal %29 {approx = true} : vector<16x1xf32> -> vector<16x1xf32>
    %31 = vector.broadcast %30 : vector<16x1xf32> to vector<16x16xf32>
    %32 = arith.mulf %27, %31 : vector<16x16xf32>
    %c0_10 = arith.constant 0 : index
    %c0_11 = arith.constant 0 : index
    %c0_12 = arith.constant 0 : index
    %c0_13 = arith.constant 0 : index
    %33 = vector.load %arg11[%c0_10, %c0_11, %c0_12, %c0_13] : memref<2x2x16x16xf32, #tpu.memory_space<vmem>>, vector<1x1x16x16xf32>
    %34 = vector.shape_cast %33 : vector<1x1x16x16xf32> to vector<16x16xf32>
    %35 = vector.shape_cast %32 : vector<16x16xf32> to vector<1x1x16x16xf32>
    tpu.vector_store %arg11[%c0_10, %c0_11, %c0_12, %c0_13], %35 {strides = array<i32>} : memref<2x2x16x16xf32, #tpu.memory_space<vmem>>, vector<1x1x16x16xf32>,
    %36 = vector.extract_strided_slice %18 {offsets = [0, 0], sizes = [16, 16], strides = [1, 1]} : vector<16x32xf32> to vector<16x16xf32>
    %cst_14 = arith.constant dense<0.000000e+00> : vector<16x16xf32>
    %37 = tpu.matmul %32, %36, %cst_14 {dimension_numbers = #tpu.dot_dimension_numbers<[1], [0], [0], [1], [0, 0, 1, 1], [], []>} : vector<16x16xf32>, vector<16x16xf32>, vector<16x16xf32> -> vector<16x16xf32>
    %38 = vector.extract_strided_slice %15 {offsets = [0, 0], sizes = [16, 32], strides = [1, 1]} : vector<32x32xf32> to vector<16x32xf32>
    %cst_15 = arith.constant dense<0.000000e+00> : vector<16x32xf32>
    %39 = tpu.matmul %37, %38, %cst_15 {dimension_numbers = #tpu.dot_dimension_numbers<[1], [0], [0], [1], [0, 0, 1, 1], [], []>} : vector<16x16xf32>, vector<16x32xf32>, vector<16x32xf32> -> vector<16x32xf32>
    %40 = vector.extract_strided_slice %16 {offsets = [0, 16], sizes = [16, 16], strides = [1, 1]} : vector<16x32xf32> to vector<16x16xf32>
    %41 = vector.extract_strided_slice %17 {offsets = [0, 16], sizes = [16, 16], strides = [1, 1]} : vector<16x32xf32> to vector<16x16xf32>
    %42 = tpu.transpose %41, [1, 0] : vector<16x16xf32> -> vector<16x16xf32>
    %cst_16 = arith.constant dense<0.000000e+00> : vector<16x16xf32>
    %43 = tpu.matmul %40, %42, %cst_16 {dimension_numbers = #tpu.dot_dimension_numbers<[1], [0], [0], [1], [0, 0, 1, 1], [], []>} : vector<16x16xf32>, vector<16x16xf32>, vector<16x16xf32> -> vector<16x16xf32>
    %cst_17 = arith.constant dense<0xFF800000> : vector<16xf32>
    %44 = vector.multi_reduction <maximumf>, %43, %cst_17 [1] : vector<16x16xf32> to vector<16xf32>
    %45 = vector.shape_cast %44 : vector<16xf32> to vector<16x1xf32>
    %46 = vector.broadcast %45 : vector<16x1xf32> to vector<16x16xf32>
    %47 = arith.subf %43, %46 : vector<16x16xf32>
    %48 = math.exp %47 : vector<16x16xf32>
    %cst_18 = arith.constant dense<0.000000e+00> : vector<16xf32>
    %49 = vector.multi_reduction <add>, %48, %cst_18 [1] : vector<16x16xf32> to vector<16xf32>
    %50 = vector.shape_cast %49 : vector<16xf32> to vector<16x1xf32>
    %51 = tpu.reciprocal %50 {approx = true} : vector<16x1xf32> -> vector<16x1xf32>
    %52 = vector.broadcast %51 : vector<16x1xf32> to vector<16x16xf32>
    %53 = arith.mulf %48, %52 : vector<16x16xf32>
    %c0_19 = arith.constant 0 : index
    %c1 = arith.constant 1 : index
    %c0_20 = arith.constant 0 : index
    %c0_21 = arith.constant 0 : index
    %54 = vector.load %arg11[%c0_19, %c1, %c0_20, %c0_21] : memref<2x2x16x16xf32, #tpu.memory_space<vmem>>, vector<1x1x16x16xf32>
    %55 = vector.shape_cast %54 : vector<1x1x16x16xf32> to vector<16x16xf32>
    %56 = vector.shape_cast %53 : vector<16x16xf32> to vector<1x1x16x16xf32>
    tpu.vector_store %arg11[%c0_19, %c1, %c0_20, %c0_21], %56 {strides = array<i32>} : memref<2x2x16x16xf32, #tpu.memory_space<vmem>>, vector<1x1x16x16xf32>,
    %57 = vector.extract_strided_slice %18 {offsets = [0, 16], sizes = [16, 16], strides = [1, 1]} : vector<16x32xf32> to vector<16x16xf32>
    %cst_22 = arith.constant dense<0.000000e+00> : vector<16x16xf32>
    %58 = tpu.matmul %53, %57, %cst_22 {dimension_numbers = #tpu.dot_dimension_numbers<[1], [0], [0], [1], [0, 0, 1, 1], [], []>} : vector<16x16xf32>, vector<16x16xf32>, vector<16x16xf32> -> vector<16x16xf32>
    %59 = vector.extract_strided_slice %15 {offsets = [16, 0], sizes = [16, 32], strides = [1, 1]} : vector<32x32xf32> to vector<16x32xf32>
    %cst_23 = arith.constant dense<0.000000e+00> : vector<16x32xf32>
    %60 = tpu.matmul %58, %59, %cst_23 {dimension_numbers = #tpu.dot_dimension_numbers<[1], [0], [0], [1], [0, 0, 1, 1], [], []>} : vector<16x16xf32>, vector<16x32xf32>, vector<16x32xf32> -> vector<16x32xf32>
    %61 = arith.addf %39, %60 : vector<16x32xf32>
    %c0_24 = arith.constant 0 : index
    %c0_25 = arith.constant 0 : index
    %62 = vector.load %arg12[%c0_24, %c0_25] : memref<32x32xf32, #tpu.memory_space<vmem>>, vector<16x32xf32>
    tpu.vector_store %arg12[%c0_24, %c0_25], %61 {strides = array<i32>} : memref<32x32xf32, #tpu.memory_space<vmem>>, vector<16x32xf32>,
    %63 = vector.extract_strided_slice %14 {offsets = [16, 0], sizes = [16, 32], strides = [1, 1]} : vector<32x96xf32> to vector<16x32xf32>
    %64 = vector.extract_strided_slice %14 {offsets = [16, 32], sizes = [16, 32], strides = [1, 1]} : vector<32x96xf32> to vector<16x32xf32>
    %65 = vector.extract_strided_slice %14 {offsets = [16, 64], sizes = [16, 32], strides = [1, 1]} : vector<32x96xf32> to vector<16x32xf32>
    %66 = vector.extract_strided_slice %63 {offsets = [0, 0], sizes = [16, 16], strides = [1, 1]} : vector<16x32xf32> to vector<16x16xf32>
    %67 = vector.extract_strided_slice %64 {offsets = [0, 0], sizes = [16, 16], strides = [1, 1]} : vector<16x32xf32> to vector<16x16xf32>
    %68 = tpu.transpose %67, [1, 0] : vector<16x16xf32> -> vector<16x16xf32>
    %cst_26 = arith.constant dense<0.000000e+00> : vector<16x16xf32>
    %69 = tpu.matmul %66, %68, %cst_26 {dimension_numbers = #tpu.dot_dimension_numbers<[1], [0], [0], [1], [0, 0, 1, 1], [], []>} : vector<16x16xf32>, vector<16x16xf32>, vector<16x16xf32> -> vector<16x16xf32>
    %cst_27 = arith.constant dense<0xFF800000> : vector<16xf32>
    %70 = vector.multi_reduction <maximumf>, %69, %cst_27 [1] : vector<16x16xf32> to vector<16xf32>
    %71 = vector.shape_cast %70 : vector<16xf32> to vector<16x1xf32>
    %72 = vector.broadcast %71 : vector<16x1xf32> to vector<16x16xf32>
    %73 = arith.subf %69, %72 : vector<16x16xf32>
    %74 = math.exp %73 : vector<16x16xf32>
    %cst_28 = arith.constant dense<0.000000e+00> : vector<16xf32>
    %75 = vector.multi_reduction <add>, %74, %cst_28 [1] : vector<16x16xf32> to vector<16xf32>
    %76 = vector.shape_cast %75 : vector<16xf32> to vector<16x1xf32>
    %77 = tpu.reciprocal %76 {approx = true} : vector<16x1xf32> -> vector<16x1xf32>
    %78 = vector.broadcast %77 : vector<16x1xf32> to vector<16x16xf32>
    %79 = arith.mulf %74, %78 : vector<16x16xf32>
    %c1_29 = arith.constant 1 : index
    %c0_30 = arith.constant 0 : index
    %c0_31 = arith.constant 0 : index
    %c0_32 = arith.constant 0 : index
    %80 = vector.load %arg11[%c1_29, %c0_30, %c0_31, %c0_32] : memref<2x2x16x16xf32, #tpu.memory_space<vmem>>, vector<1x1x16x16xf32>
    %81 = vector.shape_cast %80 : vector<1x1x16x16xf32> to vector<16x16xf32>
    %82 = vector.shape_cast %79 : vector<16x16xf32> to vector<1x1x16x16xf32>
    tpu.vector_store %arg11[%c1_29, %c0_30, %c0_31, %c0_32], %82 {strides = array<i32>} : memref<2x2x16x16xf32, #tpu.memory_space<vmem>>, vector<1x1x16x16xf32>,
    %83 = vector.extract_strided_slice %65 {offsets = [0, 0], sizes = [16, 16], strides = [1, 1]} : vector<16x32xf32> to vector<16x16xf32>
    %cst_33 = arith.constant dense<0.000000e+00> : vector<16x16xf32>
    %84 = tpu.matmul %79, %83, %cst_33 {dimension_numbers = #tpu.dot_dimension_numbers<[1], [0], [0], [1], [0, 0, 1, 1], [], []>} : vector<16x16xf32>, vector<16x16xf32>, vector<16x16xf32> -> vector<16x16xf32>
    %85 = vector.extract_strided_slice %15 {offsets = [0, 0], sizes = [16, 32], strides = [1, 1]} : vector<32x32xf32> to vector<16x32xf32>
    %cst_34 = arith.constant dense<0.000000e+00> : vector<16x32xf32>
    %86 = tpu.matmul %84, %85, %cst_34 {dimension_numbers = #tpu.dot_dimension_numbers<[1], [0], [0], [1], [0, 0, 1, 1], [], []>} : vector<16x16xf32>, vector<16x32xf32>, vector<16x32xf32> -> vector<16x32xf32>
    %87 = vector.extract_strided_slice %63 {offsets = [0, 16], sizes = [16, 16], strides = [1, 1]} : vector<16x32xf32> to vector<16x16xf32>
    %88 = vector.extract_strided_slice %64 {offsets = [0, 16], sizes = [16, 16], strides = [1, 1]} : vector<16x32xf32> to vector<16x16xf32>
    %89 = tpu.transpose %88, [1, 0] : vector<16x16xf32> -> vector<16x16xf32>
    %cst_35 = arith.constant dense<0.000000e+00> : vector<16x16xf32>
    %90 = tpu.matmul %87, %89, %cst_35 {dimension_numbers = #tpu.dot_dimension_numbers<[1], [0], [0], [1], [0, 0, 1, 1], [], []>} : vector<16x16xf32>, vector<16x16xf32>, vector<16x16xf32> -> vector<16x16xf32>
    %cst_36 = arith.constant dense<0xFF800000> : vector<16xf32>
    %91 = vector.multi_reduction <maximumf>, %90, %cst_36 [1] : vector<16x16xf32> to vector<16xf32>
    %92 = vector.shape_cast %91 : vector<16xf32> to vector<16x1xf32>
    %93 = vector.broadcast %92 : vector<16x1xf32> to vector<16x16xf32>
    %94 = arith.subf %90, %93 : vector<16x16xf32>
    %95 = math.exp %94 : vector<16x16xf32>
    %cst_37 = arith.constant dense<0.000000e+00> : vector<16xf32>
    %96 = vector.multi_reduction <add>, %95, %cst_37 [1] : vector<16x16xf32> to vector<16xf32>
    %97 = vector.shape_cast %96 : vector<16xf32> to vector<16x1xf32>
    %98 = tpu.reciprocal %97 {approx = true} : vector<16x1xf32> -> vector<16x1xf32>
    %99 = vector.broadcast %98 : vector<16x1xf32> to vector<16x16xf32>
    %100 = arith.mulf %95, %99 : vector<16x16xf32>
    %c1_38 = arith.constant 1 : index
    %c1_39 = arith.constant 1 : index
    %c0_40 = arith.constant 0 : index
    %c0_41 = arith.constant 0 : index
    %101 = vector.load %arg11[%c1_38, %c1_39, %c0_40, %c0_41] : memref<2x2x16x16xf32, #tpu.memory_space<vmem>>, vector<1x1x16x16xf32>
    %102 = vector.shape_cast %101 : vector<1x1x16x16xf32> to vector<16x16xf32>
    %103 = vector.shape_cast %100 : vector<16x16xf32> to vector<1x1x16x16xf32>
    tpu.vector_store %arg11[%c1_38, %c1_39, %c0_40, %c0_41], %103 {strides = array<i32>} : memref<2x2x16x16xf32, #tpu.memory_space<vmem>>, vector<1x1x16x16xf32>,
    %104 = vector.extract_strided_slice %65 {offsets = [0, 16], sizes = [16, 16], strides = [1, 1]} : vector<16x32xf32> to vector<16x16xf32>
    %cst_42 = arith.constant dense<0.000000e+00> : vector<16x16xf32>
    %105 = tpu.matmul %100, %104, %cst_42 {dimension_numbers = #tpu.dot_dimension_numbers<[1], [0], [0], [1], [0, 0, 1, 1], [], []>} : vector<16x16xf32>, vector<16x16xf32>, vector<16x16xf32> -> vector<16x16xf32>
    %106 = vector.extract_strided_slice %15 {offsets = [16, 0], sizes = [16, 32], strides = [1, 1]} : vector<32x32xf32> to vector<16x32xf32>
    %cst_43 = arith.constant dense<0.000000e+00> : vector<16x32xf32>
    %107 = tpu.matmul %105, %106, %cst_43 {dimension_numbers = #tpu.dot_dimension_numbers<[1], [0], [0], [1], [0, 0, 1, 1], [], []>} : vector<16x16xf32>, vector<16x32xf32>, vector<16x32xf32> -> vector<16x32xf32>
    %108 = arith.addf %86, %107 : vector<16x32xf32>
    %c16 = arith.constant 16 : index
    %c0_44 = arith.constant 0 : index
    %109 = vector.load %arg12[%c16, %c0_44] : memref<32x32xf32, #tpu.memory_space<vmem>>, vector<16x32xf32>
    tpu.vector_store %arg12[%c16, %c0_44], %108 {strides = array<i32>} : memref<32x32xf32, #tpu.memory_space<vmem>>, vector<16x32xf32>,
    %c0_45 = arith.constant 0 : index
    %c0_46 = arith.constant 0 : index
    %110 = vector.load %arg12[%c0_45, %c0_46] : memref<32x32xf32, #tpu.memory_space<vmem>>, vector<32x32xf32>
    %111 = arith.addf %0, %110 : vector<32x32xf32>
    %112 = vector.broadcast %3 : vector<1x32xf32> to vector<32x32xf32>
    %113 = arith.addf %111, %112 : vector<32x32xf32>
    %cst_47 = arith.constant dense<0.000000e+00> : vector<32xf32>
    %114 = vector.multi_reduction <add>, %113, %cst_47 [1] : vector<32x32xf32> to vector<32xf32>
    %115 = vector.shape_cast %114 : vector<32xf32> to vector<32x1xf32>
    %cst_48 = arith.constant 3.200000e+01 : f32
    %116 = vector.broadcast %cst_48 : f32 to vector<32x1xf32>
    %117 = arith.divf %115, %116 : vector<32x1xf32>
    %118 = vector.broadcast %117 : vector<32x1xf32> to vector<32x32xf32>
    %119 = arith.subf %113, %118 : vector<32x32xf32>
    %120 = arith.mulf %119, %119 : vector<32x32xf32>
    %cst_49 = arith.constant dense<0.000000e+00> : vector<32xf32>
    %121 = vector.multi_reduction <add>, %120, %cst_49 [1] : vector<32x32xf32> to vector<32xf32>
    %122 = vector.shape_cast %121 : vector<32xf32> to vector<32x1xf32>
    %cst_50 = arith.constant 3.200000e+01 : f32
    %123 = vector.broadcast %cst_50 : f32 to vector<32x1xf32>
    %124 = arith.divf %122, %123 : vector<32x1xf32>
    %125 = vector.broadcast %117 : vector<32x1xf32> to vector<32x32xf32>
    %126 = arith.subf %113, %125 : vector<32x32xf32>
    %cst_51 = arith.constant 9.99999996E-13 : f32
    %127 = vector.broadcast %cst_51 : f32 to vector<32x1xf32>
    %128 = arith.addf %124, %127 : vector<32x1xf32>
    %129 = math.rsqrt %128 : vector<32x1xf32>
    %130 = vector.broadcast %129 : vector<32x1xf32> to vector<32x32xf32>
    %131 = arith.mulf %126, %130 : vector<32x32xf32>
    %132 = vector.broadcast %7 : vector<1x32xf32> to vector<32x32xf32>
    %133 = arith.mulf %131, %132 : vector<32x32xf32>
    %134 = vector.broadcast %8 : vector<1x32xf32> to vector<32x32xf32>
    %135 = arith.addf %133, %134 : vector<32x32xf32>
    %c0_52 = arith.constant 0 : index
    %c0_53 = arith.constant 0 : index
    %136 = vector.load %arg4[%c0_52, %c0_53] : memref<32x64xf32, #tpu.memory_space<vmem>>, vector<32x64xf32>
    %cst_54 = arith.constant dense<0.000000e+00> : vector<32x64xf32>
    %137 = tpu.matmul %135, %136, %cst_54 {dimension_numbers = #tpu.dot_dimension_numbers<[1], [0], [0], [1], [0, 0, 1, 1], [], []>} : vector<32x32xf32>, vector<32x64xf32>, vector<32x64xf32> -> vector<32x64xf32>
    %138 = vector.broadcast %4 : vector<1x64xf32> to vector<32x64xf32>
    %139 = arith.addf %137, %138 : vector<32x64xf32>
    %cst_55 = arith.constant 5.000000e-01 : f32
    %140 = vector.broadcast %cst_55 : f32 to vector<32x64xf32>
    %141 = arith.mulf %140, %139 : vector<32x64xf32>
    %cst_56 = arith.constant 4.471500e-02 : f32
    %142 = vector.broadcast %cst_56 : f32 to vector<32x64xf32>
    %143 = arith.mulf %142, %139 : vector<32x64xf32>
    %144 = arith.mulf %143, %139 : vector<32x64xf32>
    %145 = arith.mulf %144, %139 : vector<32x64xf32>
    %146 = arith.addf %139, %145 : vector<32x64xf32>
    %cst_57 = arith.constant 0.797884583 : f32
    %147 = vector.broadcast %cst_57 : f32 to vector<32x64xf32>
    %148 = arith.mulf %147, %146 : vector<32x64xf32>
    %149 = math.tanh %148 : vector<32x64xf32>
    %cst_58 = arith.constant 1.000000e+00 : f32
    %150 = vector.broadcast %cst_58 : f32 to vector<32x64xf32>
    %151 = arith.addf %150, %149 : vector<32x64xf32>
    %152 = arith.mulf %141, %151 : vector<32x64xf32>
    %c0_59 = arith.constant 0 : index
    %c0_60 = arith.constant 0 : index
    %153 = vector.load %arg5[%c0_59, %c0_60] : memref<64x32xf32, #tpu.memory_space<vmem>>, vector<64x32xf32>
    %cst_61 = arith.constant dense<0.000000e+00> : vector<32x32xf32>
    %154 = tpu.matmul %152, %153, %cst_61 {dimension_numbers = #tpu.dot_dimension_numbers<[1], [0], [0], [1], [0, 0, 1, 1], [], []>} : vector<32x64xf32>, vector<64x32xf32>, vector<32x32xf32> -> vector<32x32xf32>
    %155 = vector.broadcast %5 : vector<1x32xf32> to vector<32x32xf32>
    %156 = arith.addf %154, %155 : vector<32x32xf32>
    %157 = arith.addf %135, %156 : vector<32x32xf32>
    %cst_62 = arith.constant dense<0.000000e+00> : vector<32xf32>
    %158 = vector.multi_reduction <add>, %157, %cst_62 [1] : vector<32x32xf32> to vector<32xf32>
    %159 = vector.shape_cast %158 : vector<32xf32> to vector<32x1xf32>
    %cst_63 = arith.constant 3.200000e+01 : f32
    %160 = vector.broadcast %cst_63 : f32 to vector<32x1xf32>
    %161 = arith.divf %159, %160 : vector<32x1xf32>
    %162 = vector.broadcast %161 : vector<32x1xf32> to vector<32x32xf32>
    %163 = arith.subf %157, %162 : vector<32x32xf32>
    %164 = arith.mulf %163, %163 : vector<32x32xf32>
    %cst_64 = arith.constant dense<0.000000e+00> : vector<32xf32>
    %165 = vector.multi_reduction <add>, %164, %cst_64 [1] : vector<32x32xf32> to vector<32xf32>
    %166 = vector.shape_cast %165 : vector<32xf32> to vector<32x1xf32>
    %cst_65 = arith.constant 3.200000e+01 : f32
    %167 = vector.broadcast %cst_65 : f32 to vector<32x1xf32>
    %168 = arith.divf %166, %167 : vector<32x1xf32>
    %169 = vector.broadcast %161 : vector<32x1xf32> to vector<32x32xf32>
    %170 = arith.subf %157, %169 : vector<32x32xf32>
    %cst_66 = arith.constant 9.99999996E-13 : f32
    %171 = vector.broadcast %cst_66 : f32 to vector<32x1xf32>
    %172 = arith.addf %168, %171 : vector<32x1xf32>
    %173 = math.rsqrt %172 : vector<32x1xf32>
    %174 = vector.broadcast %173 : vector<32x1xf32> to vector<32x32xf32>
    %175 = arith.mulf %170, %174 : vector<32x32xf32>
    %176 = vector.broadcast %9 : vector<1x32xf32> to vector<32x32xf32>
    %177 = arith.mulf %175, %176 : vector<32x32xf32>
    %178 = vector.broadcast %10 : vector<1x32xf32> to vector<32x32xf32>
    %179 = arith.addf %177, %178 : vector<32x32xf32>
    %c0_67 = arith.constant 0 : index
    %c0_68 = arith.constant 0 : index
    %180 = vector.load %arg10[%c0_67, %c0_68] : memref<32x32xf32, #tpu.memory_space<vmem>>, vector<32x32xf32>
    tpu.vector_store %arg10[%c0_67, %c0_68], %179 {strides = array<i32>} : memref<32x32xf32, #tpu.memory_space<vmem>>, vector<32x32xf32>,
    %c0_69 = arith.constant 0 : index
    %c0_70 = arith.constant 0 : index
    %181 = vector.load %arg6[%c0_69, %c0_70] : memref<32x32xf32, #tpu.memory_space<vmem>>, vector<32x32xf32>
    %cst_71 = arith.constant dense<0.000000e+00> : vector<32x32xf32>
    %182 = tpu.matmul %179, %181, %cst_71 {dimension_numbers = #tpu.dot_dimension_numbers<[1], [0], [0], [1], [0, 0, 1, 1], [], []>} : vector<32x32xf32>, vector<32x32xf32>, vector<32x32xf32> -> vector<32x32xf32>
    %183 = vector.broadcast %6 : vector<1x32xf32> to vector<32x32xf32>
    %184 = arith.addf %182, %183 : vector<32x32xf32>
    %cst_72 = arith.constant 5.000000e-01 : f32
    %185 = vector.broadcast %cst_72 : f32 to vector<32x32xf32>
    %186 = arith.mulf %185, %184 : vector<32x32xf32>
    %cst_73 = arith.constant 4.471500e-02 : f32
    %187 = vector.broadcast %cst_73 : f32 to vector<32x32xf32>
    %188 = arith.mulf %187, %184 : vector<32x32xf32>
    %189 = arith.mulf %188, %184 : vector<32x32xf32>
    %190 = arith.mulf %189, %184 : vector<32x32xf32>
    %191 = arith.addf %184, %190 : vector<32x32xf32>
    %cst_74 = arith.constant 0.797884583 : f32
    %192 = vector.broadcast %cst_74 : f32 to vector<32x32xf32>
    %193 = arith.mulf %192, %191 : vector<32x32xf32>
    %194 = math.tanh %193 : vector<32x32xf32>
    %cst_75 = arith.constant 1.000000e+00 : f32
    %195 = vector.broadcast %cst_75 : f32 to vector<32x32xf32>
    %196 = arith.addf %195, %194 : vector<32x32xf32>
    %197 = arith.mulf %186, %196 : vector<32x32xf32>
    %c0_76 = arith.constant 0 : index
    %c0_77 = arith.constant 0 : index
    %198 = vector.load %arg8[%c0_76, %c0_77] : memref<32x32xf32, #tpu.memory_space<vmem>>, vector<32x32xf32>
    tpu.vector_store %arg8[%c0_76, %c0_77], %197 {strides = array<i32>} : memref<32x32xf32, #tpu.memory_space<vmem>>, vector<32x32xf32>,
    %199 = tpu.iota {dimensions = array<i32: 1>} : vector<8x16xi32>
    %c0_78 = arith.constant 0 : index
    %c0_79 = arith.constant 0 : index
    %200 = vector.load %arg1[%c0_78, %c0_79] : memref<8x2xi32, #tpu.memory_space<vmem>>, vector<8x2xi32>
    %201 = vector.extract_strided_slice %200 {offsets = [0, 0], sizes = [8, 1], strides = [1, 1]} : vector<8x2xi32> to vector<8x1xi32>
    %202 = vector.broadcast %201 : vector<8x1xi32> to vector<8x16xi32>
    %203 = arith.cmpi eq, %199, %202 : vector<8x16xi32>
    %204 = arith.extui %203 : vector<8x16xi1> to vector<8x16xi32>
    %205 = arith.sitofp %204 : vector<8x16xi32> to vector<8x16xf32>
    %206 = vector.extract_strided_slice %197 {offsets = [0, 0], sizes = [16, 32], strides = [1, 1]} : vector<32x32xf32> to vector<16x32xf32>
    %cst_80 = arith.constant dense<0.000000e+00> : vector<8x32xf32>
    %207 = tpu.matmul %205, %206, %cst_80 {dimension_numbers = #tpu.dot_dimension_numbers<[1], [0], [0], [1], [0, 0, 1, 1], [], []>} : vector<8x16xf32>, vector<16x32xf32>, vector<8x32xf32> -> vector<8x32xf32>
    %c0_81 = arith.constant 0 : index
    %c0_82 = arith.constant 0 : index
    %c0_83 = arith.constant 0 : index
    %208 = vector.load %arg9[%c0_81, %c0_82, %c0_83] : memref<2x8x32xf32, #tpu.memory_space<vmem>>, vector<1x8x32xf32>
    %209 = vector.shape_cast %208 : vector<1x8x32xf32> to vector<8x32xf32>
    %210 = vector.shape_cast %207 : vector<8x32xf32> to vector<1x8x32xf32>
    tpu.vector_store %arg9[%c0_81, %c0_82, %c0_83], %210 {strides = array<i32>} : memref<2x8x32xf32, #tpu.memory_space<vmem>>, vector<1x8x32xf32>,
    %211 = vector.extract_strided_slice %200 {offsets = [0, 1], sizes = [8, 1], strides = [1, 1]} : vector<8x2xi32> to vector<8x1xi32>
    %212 = vector.broadcast %211 : vector<8x1xi32> to vector<8x16xi32>
    %213 = arith.cmpi eq, %199, %212 : vector<8x16xi32>
    %214 = arith.extui %213 : vector<8x16xi1> to vector<8x16xi32>
    %215 = arith.sitofp %214 : vector<8x16xi32> to vector<8x16xf32>
    %216 = vector.extract_strided_slice %197 {offsets = [16, 0], sizes = [16, 32], strides = [1, 1]} : vector<32x32xf32> to vector<16x32xf32>
    %cst_84 = arith.constant dense<0.000000e+00> : vector<8x32xf32>
    %217 = tpu.matmul %215, %216, %cst_84 {dimension_numbers = #tpu.dot_dimension_numbers<[1], [0], [0], [1], [0, 0, 1, 1], [], []>} : vector<8x16xf32>, vector<16x32xf32>, vector<8x32xf32> -> vector<8x32xf32>
    %c1_85 = arith.constant 1 : index
    %c0_86 = arith.constant 0 : index
    %c0_87 = arith.constant 0 : index
    %218 = vector.load %arg9[%c1_85, %c0_86, %c0_87] : memref<2x8x32xf32, #tpu.memory_space<vmem>>, vector<1x8x32xf32>
    %219 = vector.shape_cast %218 : vector<1x8x32xf32> to vector<8x32xf32>
    %220 = vector.shape_cast %217 : vector<8x32xf32> to vector<1x8x32xf32>
    tpu.vector_store %arg9[%c1_85, %c0_86, %c0_87], %220 {strides = array<i32>} : memref<2x8x32xf32, #tpu.memory_space<vmem>>, vector<1x8x32xf32>,
    return
  }
}

</mosaic_0001>

<bundles_post_ra>
// kernel: tpu_custom_call.1
= control target key start
LH: loop header
LB: loop body
LE: loop exit
PB: predicated region body
PF: predicated region fallthrough
CT: control target
= control target key end

     0   :  { %17 = vsyncpa [#allocation4], 0  ;;  %s3259_s0 = inlined_call_operand.vmem [shape: f32[32,32], index: 0, kind: input, shape index: {}]   ;;  %s3260_s1 = inlined_call_operand.vmem [shape: s32[8,2], index: 1, kind: input, shape index: {}]   ;;  %s3261_s2 = inlined_call_operand.vmem [shape: f32[32,96], index: 2, kind: input, shape index: {}]   ;;  %s3262_s3 = inlined_call_operand.vmem [shape: f32[32,32], index: 3, kind: input, shape index: {}]   ;;  %s3263_s4 = inlined_call_operand.hbm [shape: f32[32,64], index: 4, kind: input, shape index: {}]   ;;  %s3264_s5 = inlined_call_operand.vmem [shape: f32[64,32], index: 5, kind: input, shape index: {}]   ;;  %s3265_s6 = inlined_call_operand.vmem [shape: f32[32,32], index: 6, kind: input, shape index: {}]   ;;  %s3266_s7 = inlined_call_operand.hbm [shape: f32[9,96], index: 7, kind: input, shape index: {}]   ;;  %s3267_s8 = inlined_call_operand.hbm [shape: f32[32,32], index: 8, kind: output, shape index: {0}]   ;;  %s3268_s9 = inlined_call_operand.hbm [shape: f32[2,8,32], index: 9, kind: output, shape index: {1}]   ;;  %s3269_s10 = inlined_call_operand.hbm [shape: f32[32,32], index: 10, kind: output, shape index: {2}]   ;;  %s3270_s11 = inlined_call_operand.hbm [shape: f32[2,2,16,16], index: 11, kind: output, shape index: {3}]  }
   0x1   :  { %18 = vsyncpa [#allocation7], 0 }
   0x2   :  { %19 = vsyncpa [#allocation5], 0 }
   0x3   :  { %20 = vsyncpa [#allocation10], 0 }
   0x4   :  { %21 = vsyncpa [#allocation13], 0  ;;  %s2780_s17 = smov [#allocation3]   ;;  %s2638_s21 = scalar_lea.hbm %s3263_s4, 512 }
   0x5   :  { %s35_s18 = sshll.u32 %s2780_s17, 4  ;;  %p2639_p0 = scmp.ne.s32.totalorder %s3263_s4, %s2638_s21  ;;  %s36_s18 = int_to_ptr.vmem [resolvable:$true] %s35_s18 }
   0x6   :  { %p2642_p1 = scmp.lt.u32.totalorder %s2638_s21, %s3263_s4 }
   0x8   :  { %p2644_p2 = pnand %p2642_p1, %p2639_p0 }
   0xa   :  { %2647 = shalt.err (!%p2644_p2)
}
   0xb   :  { %s2648_s26 = scalar_lea.vmem %s36_s18, 512  ;;  %p2653_p4 = scmp.lt.s32.totalorder %s36_s18, %s36_s18 }
   0xc   :  { %p2649_p3 = scmp.ne.s32.totalorder %s36_s18, %s2648_s26  ;;  %p2654_p5 = scmp.lt.s32.totalorder %s2648_s26, %s2648_s26 }
   0xe   :  { %p2655_p6 = por %p2654_p5, %p2653_p4 }
  0x10   :  { %p2656_p7 = pnand %p2655_p6, %p2649_p3 }
  0x12   :  { %2659 = shalt.err (!%p2656_p7)
}
  0x13   :  { %s2781_s27 = smov 128   ;;  %s2782_s28 = smov 8  }
  0x14   :  { %41 = dma.hbm_to_vmem [thread:$0]  %s3263_s4, 512, %s36_s18, [#allocation4], %s2781_s27, %s2781_s27, %s2782_s28  }
  0x15   :  { %s2783_s12 = smov [#allocation6]   ;;  %s2660_s16 = scalar_lea.hbm %s3266_s7, 256 }
  0x16   :  { %s51_s13 = sshll.u32 %s2783_s12, 4  ;;  %p2661_p8 = scmp.ne.s32.totalorder %s3266_s7, %s2660_s16  ;;  %s52_s13 = int_to_ptr.vmem [resolvable:$true] %s51_s13 }
  0x17   :  { %p2664_p9 = scmp.lt.u32.totalorder %s2660_s16, %s3266_s7 }
  0x19   :  { %p2666_p10 = pnand %p2664_p9, %p2661_p8 }
  0x1b   :  { %2669 = shalt.err (!%p2666_p10)
}
  0x1c   :  { %s2670_s22 = scalar_lea.vmem %s52_s13, 256  ;;  %p2675_p12 = scmp.lt.s32.totalorder %s52_s13, %s52_s13 }
  0x1d   :  { %p2671_p11 = scmp.ne.s32.totalorder %s52_s13, %s2670_s22  ;;  %p2676_p13 = scmp.lt.s32.totalorder %s2670_s22, %s2670_s22 }
  0x1f   :  { %p2677_p0 = por %p2676_p13, %p2675_p12 }
  0x21   :  { %p2678_p1 = pnand %p2677_p0, %p2671_p11 }
  0x23   :  { %2681 = shalt.err (!%p2678_p1)
}
  0x24   :  { %57 = dma.hbm_to_vmem [thread:$0]  %s3266_s7, 256, %s52_s13, [#allocation7], %s2781_s27, %s2781_s27, %s2782_s28  }
  0x25   :  { %2770 = dma.done.wait [#allocation4], 512  }
  0x26   :  { %2771 = vsyncadd [#allocation4], 4294966784 }
  0x27   :  { %2772 = dma.done.wait [#allocation7], 256  }
  0x28   :  { %2773 = vsyncadd [#allocation7], 4294967040  ;;  %vm78_vm0 = vcmask 261120   ;;  %v70_v0 = vld [vmem:[%s3261_s2] sm:$0xff]  ;;  %v71_v1 = vld [vmem:[%s3261_s2 + $0x8] sm:$0xff]  ;;  %v74_v10 = vlaneseq  ;;  %vm186_vm1 = vcmask 130048  }
  0x29   :  { %v72_v2 = vld [vmem:[%s3261_s2 + $0x10] sm:$0xff]  ;;  %v2407_v3 = vpack.c.bf16 %v71_v1, %v70_v0  ;;  %v73_v4 = vld [vmem:[%s3261_s2 + $0x18] sm:$0xff]  ;;  %v2903_v5 = vld [vmem:[%s3259_s0] sm:$0xff]  ;;  %s2785_s21 = smov 96   ;;  %s2786_s22 = smov 80   ;;  %vm1554_vm3 = vcmask 523264  }
  0x2a   :  { %v2411_v6 = vpack.c.bf16 %v73_v4, %v72_v2  ;;  %2253 = vmatprep.mubr.msk.f32.mxu0 %vm78_vm0, %v2903_v5  ;;  %v2910_v7 = vld [vmem:[%s3259_s0 + $0x8] sm:$0xff]  ;;  %v2917_v8 = vld [vmem:[%s3259_s0 + $0x10] sm:$0xff]  ;;  %v2922_v9 = vld [vmem:[%s3259_s0 + $0x18] sm:$0xff]  ;;  %v2929_v11 = vshrl.u32 %v74_v10, 7  ;;  %s2784_s0 = smov 112   ;;  %s2787_s4 = smov 64  }
  0x2b   :  { %2408 = vmatprep.subr.bf16.mxu0 %v2407_v3  ;;  %v2932_v13 = vld [vmem:[#allocation6] sm:$0xff]  ;;  %vm2951_vm2 = vmpackc.low %vm186_vm1, %vm186_vm1  ;;  %s2788_s18 = smov 48   ;;  %vm2792_vm4 = vmmov 0  }
  0x2c   :  { %2410 = vmatpush3.bf16.msra.mxu0 %v2407_v3  ;;  %v76_v12 = vsub.s32 0, %v2929_v11  ;;  %v176_v24 = vld [vmem:[%s3262_s3] sm:$0xff] }
  0x2d   :  { %2412 = vmatprep.subr.bf16.mxu0 %v2411_v6 }
  0x2e   :  { %v2935_v14 = vrot.slane %v2932_v13, %v76_v12 }
  0x30   :  { %2414 = vmatpush3.bf16.msra.mxu0 %v2411_v6 }
  0x33   :  { %2254 = vmatmul.mubr.msk.f32.vlgmr.msra.gmra.mrb[0].mxu0 %vm78_vm0, %v2910_v7 }
  0x34   :  { %2256 = vmatprep.mubr.msk.f32.mxu0 %vm78_vm0, %v2917_v8 }
  0x37   :  { %2257 = vmatmul.mubr.msk.f32.gmra.mrb[2].mxu0 %vm78_vm0, %v2922_v9 }
 0x106   :  { %v2255_v15 = vpop.f32.mrb[0].mxu0 }
 0x107   :  { %v163_v16 = vadd.f32 %v2255_v15, %v2935_v14  ;;  %v157_v17 = vpop.f32.mrb[1].mxu0 }
 0x108   :  { %v158_v18 = vadd.f32 %v157_v17, %v2935_v14 }
 0x10a   :  { %381 = vrot.lane.b32.xlu1 %v158_v18, %s2784_s0  ;;  %2263 = vmatprep.mubr.msk.f32.mxu1 %vm186_vm1, %v158_v18  ;;  %v2941_v19 = vpack.i.bf16 %v163_v16, %v158_v18  ;;  %v2258_v31 = vpop.f32.mrb[2].mxu0 }
 0x10b   :  { %v167_v32 = vpop.f32.mrb[3].mxu0  ;;  %v173_v61 = vadd.f32 %v2258_v31, %v2935_v14 }
 0x10c   :  { %2532 = vrot.lane.b32.xlu0 %v2941_v19, %s2785_s21  ;;  %v168_v62 = vadd.f32 %v167_v32, %v2935_v14 }
 0x10e   :  { %383 = vrot.lane.b32.xlu1 %v163_v16, %s2784_s0  ;;  %v2976_v63 = vpack.i.bf16 %v173_v61, %v168_v62 }
 0x110   :  { %2537 = vrot.lane.b32.xlu0 %v2941_v19, %s2786_s22 }
 0x17c   :  { %v382_v20 = vpop.permute.xlu1 %381 }
 0x17d   :  { %2277 = vmatprep.mubr.msk.f32.mxu0 %vm186_vm1, %v382_v20 }
 0x17e   :  { %v2533_v21 = vpop.permute.xlu0 %2532 }
 0x17f   :  { %v2535_v22 = vunpack.i.h.bf16 %v2533_v21  ;;  %v2534_v23 = vunpack.i.l.bf16 %v2533_v21 }
 0x180   :  { %v384_v30 = vpop.permute.xlu1 %383 }
 0x181   :  { %v2415_v25 = vpack.c.bf16 %v2535_v22, %v2534_v23 }
 0x182   :  { %v2538_v26 = vpop.permute.xlu0 %2537 }
 0x183   :  { %v2540_v27 = vunpack.i.h.bf16 %v2538_v26  ;;  %v2539_v28 = vunpack.i.l.bf16 %v2538_v26  ;;  %2417 = vmatprep.subr.msk.bf16.mxu1 %vm2951_vm2, %v2415_v25 }
 0x184   :  { %2420 = vmatpush3.bf16.xpose.msk.msra.mxu1 %vm2951_vm2, %v2415_v25 }
 0x185   :  { %v2425_v29 = vpack.c.bf16 %v2540_v27, %v2539_v28 }
 0x187   :  { %2427 = vmatprep.subr.msk.bf16.mxu0 %vm2951_vm2, %v2425_v29 }
 0x188   :  { %2430 = vmatpush3.bf16.xpose.msk.msra.mxu0 %vm2951_vm2, %v2425_v29 }
 0x18b   :  { %2264 = vmatmul.mubr.msk.f32.vlgmr.msra.gmra.mrb[0].mxu1 %vm186_vm1, %v163_v16 }
 0x18f   :  { %2278 = vmatmul.mubr.msk.f32.vlgmr.msra.gmra.mrb[4].mxu0 %vm186_vm1, %v384_v30 }
 0x25e   :  { %v2265_v33 = vpop.f32.mrb[0].mxu1 }
 0x25f   :  { %v261_v34 = vpop.f32.mrb[1].mxu1  ;;  %v273_v35 = vsel %vm186_vm1, %v2265_v33, -inf }
 0x260   :  { %274 = vmax.xlane.f32.xlu1 %v273_v35  ;;  %v270_v36 = vsel %vm186_vm1, %v261_v34, -inf }
 0x261   :  { %271 = vmax.xlane.f32.xlu0 %v270_v36 }
 0x262   :  { %v2279_v37 = vpop.f32.mrb[4].mxu0 }
 0x263   :  { %v463_v38 = vpop.f32.mrb[5].mxu0  ;;  %v475_v40 = vsel %vm186_vm1, %v2279_v37, -inf }
 0x264   :  { %v472_v39 = vsel %vm186_vm1, %v463_v38, -inf }
 0x265   :  { %473 = vmax.xlane.f32.xlu0 %v472_v39  ;;  %v179_v39 = vld [vmem:[%s3262_s3 + $0x18] sm:$0xff] }
 0x269   :  { %476 = vmax.xlane.f32.xlu0 %v475_v40 }
 0x271   :  { %2542 = vrot.lane.b32.xlu1 %v2941_v19, %s2787_s4 }
 0x2ed   :  { %v275_v41 = vpop.xlane.xlu1 %274 }
 0x2ee   :  { %v277_v42 = vsub.f32 %v2265_v33, %v275_v41  ;;  %v272_v43 = vpop.xlane.xlu0 %271  ;;  %v177_v41 = vld [vmem:[%s3262_s3 + $0x8] sm:$0xff] }
 0x2ef   :  { %v276_v44 = vsub.f32 %v261_v34, %v272_v43 }
 0x2f0   :  { %v280_v45 = vmul.f32 1.442695, %v277_v42  ;;  %v3023_v42 = vpack.c.bf16 %v177_v41, %v176_v24 }
 0x2f1   :  { %v278_v46 = vmul.f32 1.442695, %v276_v44  ;;  %v2543_v47 = vpop.permute.xlu1 %2542 }
 0x2f2   :  { %2573 = vpow2.f32 %v280_v45  ;;  %v2545_v48 = vunpack.i.h.bf16 %v2543_v47  ;;  %v2544_v49 = vunpack.i.l.bf16 %v2543_v47  ;;  %v474_v50 = vpop.xlane.xlu0 %473 }
 0x2f3   :  { %2575 = vpow2.f32 %v278_v46  ;;  %v478_v0 = vsub.f32 %v463_v38, %v474_v50  ;;  %v178_v38 = vld [vmem:[%s3262_s3 + $0x10] sm:$0xff] }
 0x2f4   :  { %v2421_v51 = vpack.c.bf16 %v2545_v48, %v2544_v49  ;;  %v3013_v40 = vpack.c.bf16 %v179_v39, %v178_v38 }
 0x2f5   :  { %v480_v1 = vmul.f32 1.442695, %v478_v0 }
 0x2f6   :  { %2422 = vmatprep.subr.bf16.mxu1 %v2421_v51  ;;  %v477_v52 = vpop.xlane.xlu0 %476  ;;  %2436 = vmatprep.subr.bf16.mxu0 %v3013_v40 }
 0x2f7   :  { %v479_v53 = vsub.f32 %v2279_v37, %v477_v52  ;;  %2424 = vmatpush3.bf16.msra.mxu1 %v2421_v51  ;;  %2438 = vmatpush3.bf16.msra.mxu0 %v3013_v40 }
 0x2f8   :  { %2440 = vmatprep.subr.bf16.mxu0 %v3023_v42 }
 0x2f9   :  { %v482_v54 = vmul.f32 1.442695, %v479_v53 }
 0x2fb   :  { %2577 = vpow2.f32 %v482_v54 }
 0x2fc   :  { %v2574_v55 = vpop.eup %2573  ;;  %2579 = vpow2.f32 %v480_v1 }
 0x2fd   :  { %v2576_v56 = vpop.eup %2575  ;;  %v285_v57 = vsel %vm186_vm1, %v2574_v55, 0.0 }
 0x2fe   :  { %286 = vadd.xlane.f32.xlu0 %v285_v57  ;;  %v282_v58 = vsel %vm186_vm1, %v2576_v56, 0.0 }
 0x2ff   :  { %283 = vadd.xlane.f32.xlu1 %v282_v58 }
 0x305   :  { %v2578_v59 = vpop.eup %2577 }
 0x306   :  { %v487_v60 = vsel %vm186_vm1, %v2578_v59, 0.0  ;;  %v2580_v2 = vpop.eup %2579 }
 0x307   :  { %488 = vadd.xlane.f32.xlu0 %v487_v60  ;;  %v484_v3 = vsel %vm186_vm1, %v2580_v2, 0.0 }
 0x310   :  { %2552 = vrot.lane.b32.xlu1 %v2976_v63, %s2785_s21 }
 0x31d   :  { %2547 = vrot.lane.b32.xlu0 %v2941_v19, %s2788_s18 }
 0x321   :  { %949 = vrot.lane.b32.xlu0 %v168_v62, %s2784_s0 }
 0x334   :  { %485 = vadd.xlane.f32.xlu1 %v484_v3 }
 0x345   :  { %2557 = vrot.lane.b32.xlu1 %v2976_v63, %s2786_s22 }
 0x349   :  { %951 = vrot.lane.b32.xlu1 %v173_v61, %s2784_s0 }
 0x38b   :  { %v287_v4 = vpop.xlane.xlu0 %286 }
 0x38c   :  { %2581 = vrcp.f32 %v287_v4  ;;  %v284_v6 = vpop.xlane.xlu1 %283 }
 0x38d   :  { %2583 = vrcp.f32 %v284_v6 }
 0x390   :  { %v2553_v15 = vpop.permute.xlu1 %2552 }
 0x391   :  { %v2555_v20 = vunpack.i.h.bf16 %v2553_v15  ;;  %v2554_v21 = vunpack.i.l.bf16 %v2553_v15 }
 0x393   :  { %v2443_v26 = vpack.c.bf16 %v2555_v20, %v2554_v21  ;;  %v1326_v21 = vsub.s32 1, %v2929_v11 }
 0x394   :  { %v489_v12 = vpop.xlane.xlu0 %488 }
 0x395   :  { %2585 = vrcp.f32 %v489_v12 }
 0x396   :  { %v2582_v14 = vpop.eup %2581 }
 0x397   :  { %v2584_v16 = vpop.eup %2583  ;;  %v291_v17 = vmul.f32 %v2582_v14, %v2574_v55 }
 0x398   :  { %v2548_v18 = vpop.permute.xlu0 %2547  ;;  %v290_v19 = vmul.f32 %v2584_v16, %v2576_v56 }
 0x399   :  { %293 = vst.msk [vmem:[#allocation12 + $0x8] sm:$0xff] %vm186_vm1, %v291_v17  ;;  %v2550_v22 = vunpack.i.h.bf16 %v2548_v18  ;;  %v2549_v23 = vunpack.i.l.bf16 %v2548_v18 }
 0x39a   :  { %292 = vst.msk [vmem:[#allocation12] sm:$0xff] %vm186_vm1, %v290_v19  ;;  %2270 = vmatprep.mubr.msk.f32.mxu1 %vm186_vm1, %v290_v19 }
 0x39b   :  { %v2431_v25 = vpack.c.bf16 %v2550_v22, %v2549_v23  ;;  %2271 = vmatmul.mubr.msk.f32.vlgmr.msra.gmra.mrb[2].mxu1 %vm186_vm1, %v291_v17  ;;  %v3047_v22 = vrot.slane %v2932_v13, %v1326_v21 }
 0x39c   :  { %v950_v36 = vpop.permute.xlu0 %949 }
 0x39d   :  { %2432 = vmatprep.subr.bf16.mxu1 %v2431_v25 }
 0x39e   :  { %2434 = vmatpush3.bf16.msra.mxu1 %v2431_v25 }
 0x39f   :  { %v2586_v27 = vpop.eup %2585  ;;  %2445 = vmatprep.subr.msk.bf16.mxu1 %vm2951_vm2, %v2443_v26 }
 0x3a0   :  { %v493_v28 = vmul.f32 %v2586_v27, %v2578_v59 }
 0x3a2   :  { %496 = vst.msk [vmem:[#allocation12 + $0x18] sm:$0xff] %vm186_vm1, %v493_v28 }
 0x3c1   :  { %v486_v29 = vpop.xlane.xlu1 %485 }
 0x3c2   :  { %2587 = vrcp.f32 %v486_v29 }
 0x3c5   :  { %v2558_v30 = vpop.permute.xlu1 %2557 }
 0x3c6   :  { %v2560_v32 = vunpack.i.h.bf16 %v2558_v30  ;;  %v2559_v33 = vunpack.i.l.bf16 %v2558_v30 }
 0x3c8   :  { %v2453_v35 = vpack.c.bf16 %v2560_v32, %v2559_v33 }
 0x3c9   :  { %v952_v37 = vpop.permute.xlu1 %951 }
 0x3cc   :  { %v2588_v31 = vpop.eup %2587 }
 0x3cd   :  { %v492_v34 = vmul.f32 %v2588_v31, %v2580_v2 }
 0x3cf   :  { %495 = vst.msk [vmem:[#allocation12 + $0x10] sm:$0xff] %vm186_vm1, %v492_v34  ;;  %2284 = vmatprep.mubr.msk.f32.mxu1 %vm186_vm1, %v492_v34 }
 0x3d0   :  { %2285 = vmatmul.mubr.msk.f32.vlgmr.msra.gmra.mrb[4].mxu1 %vm186_vm1, %v493_v28 }
 0x3d1   :  { %2448 = vmatpush3.bf16.xpose.msk.msra.mxu1 %vm2951_vm2, %v2443_v26  ;;  %2305 = vmatprep.mubr.msk.f32.mxu1 %vm186_vm1, %v168_v62 }
 0x3d2   :  { %2455 = vmatprep.subr.msk.bf16.mxu1 %vm2951_vm2, %v2453_v35 }
 0x3d8   :  { %2306 = vmatmul.mubr.msk.f32.vlgmr.msra.gmra.mrb[6].mxu1 %vm186_vm1, %v173_v61 }
 0x3d9   :  { %2458 = vmatpush3.bf16.xpose.msk.msra.mxu1 %vm2951_vm2, %v2453_v35  ;;  %2319 = vmatprep.mubr.msk.f32.mxu1 %vm186_vm1, %v950_v36 }
 0x3e0   :  { %2320 = vmatmul.mubr.msk.f32.vlgmr.msra.gmra.mrb[8].mxu1 %vm186_vm1, %v952_v37 }
 0x46e   :  { %v2272_v43 = vpop.f32.mrb[2].mxu1 }
 0x46f   :  { %v372_v44 = vpop.f32.mrb[3].mxu1 }
 0x4a3   :  { %v2286_v45 = vpop.f32.mrb[4].mxu1 }
 0x4a4   :  { %v575_v46 = vpop.f32.mrb[5].mxu1 }
 0x4a5   :  { %2291 = vmatprep.mubr.msk.f32.mxu0 %vm186_vm1, %v575_v46 }
 0x4a6   :  { %2292 = vmatmul.mubr.msk.f32.vlgmr.msra.gmra.mrb[6].mxu0 %vm186_vm1, %v2286_v45 }
 0x4a7   :  { %2298 = vmatprep.mubr.msk.f32.mxu0 %vm186_vm1, %v372_v44  ;;  %2442 = vmatpush3.bf16.msra.mxu0 %v3023_v42 }
 0x4ab   :  { %v2307_v47 = vpop.f32.mrb[6].mxu1 }
 0x4ac   :  { %v828_v48 = vpop.f32.mrb[7].mxu1  ;;  %v840_v49 = vsel %vm186_vm1, %v2307_v47, -inf }
 0x4ad   :  { %841 = vmax.xlane.f32.xlu1 %v840_v49  ;;  %v837_v50 = vsel %vm186_vm1, %v828_v48, -inf }
 0x4ae   :  { %838 = vmax.xlane.f32.xlu0 %v837_v50  ;;  %2299 = vmatmul.mubr.msk.f32.vlgmr.msra.gmra.mrb[6].mxu0 %vm186_vm1, %v2272_v43 }
 0x4b3   :  { %v2321_v51 = vpop.f32.mrb[8].mxu1 }
 0x4b4   :  { %v1031_v52 = vpop.f32.mrb[9].mxu1  ;;  %v1043_v54 = vsel %vm186_vm1, %v2321_v51, -inf }
 0x4b5   :  { %v1040_v53 = vsel %vm186_vm1, %v1031_v52, -inf }
 0x4b6   :  { %1041 = vmax.xlane.f32.xlu0 %v1040_v53 }
 0x4ba   :  { %1044 = vmax.xlane.f32.xlu0 %v1043_v54 }
 0x53a   :  { %v842_v55 = vpop.xlane.xlu1 %841 }
 0x53b   :  { %v844_v56 = vsub.f32 %v2307_v47, %v842_v55  ;;  %v839_v57 = vpop.xlane.xlu0 %838 }
 0x53c   :  { %v843_v58 = vsub.f32 %v828_v48, %v839_v57 }
 0x53d   :  { %v847_v59 = vmul.f32 1.442695, %v844_v56 }
 0x53e   :  { %v845_v60 = vmul.f32 1.442695, %v843_v58 }
 0x53f   :  { %2589 = vpow2.f32 %v847_v59 }
 0x540   :  { %2591 = vpow2.f32 %v845_v60 }
 0x543   :  { %v1042_v61 = vpop.xlane.xlu0 %1041 }
 0x544   :  { %v1046_v62 = vsub.f32 %v1031_v52, %v1042_v61 }
 0x546   :  { %v1048_v0 = vmul.f32 1.442695, %v1046_v62 }
 0x547   :  { %v1045_v1 = vpop.xlane.xlu0 %1044 }
 0x548   :  { %2593 = vpow2.f32 %v1048_v0  ;;  %v1047_v2 = vsub.f32 %v2321_v51, %v1045_v1 }
 0x549   :  { %v2590_v3 = vpop.eup %2589 }
 0x54a   :  { %v2592_v4 = vpop.eup %2591  ;;  %v1050_v6 = vmul.f32 1.442695, %v1047_v2  ;;  %v852_v12 = vsel %vm186_vm1, %v2590_v3, 0.0 }
 0x54b   :  { %853 = vadd.xlane.f32.xlu0 %v852_v12  ;;  %v849_v14 = vsel %vm186_vm1, %v2592_v4, 0.0 }
 0x54c   :  { %2595 = vpow2.f32 %v1050_v6  ;;  %850 = vadd.xlane.f32.xlu1 %v849_v14 }
 0x552   :  { %v2594_v15 = vpop.eup %2593 }
 0x553   :  { %v1052_v16 = vsel %vm186_vm1, %v2594_v15, 0.0 }
 0x554   :  { %1053 = vadd.xlane.f32.xlu1 %v1052_v16 }
 0x556   :  { %v2596_v17 = vpop.eup %2595 }
 0x557   :  { %v1055_v18 = vsel %vm186_vm1, %v2596_v17, 0.0 }
 0x558   :  { %1056 = vadd.xlane.f32.xlu0 %v1055_v18  ;;  %v1404_v18 = vld [vmem:[#allocation3 + $0x18] sm:$0xff] }
 0x565   :  { %2562 = vrot.lane.b32.xlu1 %v2976_v63, %s2787_s4 }
 0x56e   :  { %2567 = vrot.lane.b32.xlu0 %v2976_v63, %s2788_s18 }
 0x581   :  { %v2300_v19 = vpop.f32.mrb[6].mxu0 }
 0x582   :  { %747 = vst.msk [vmem:[#allocation2 + $0x8] sm:$0xff] %vm78_vm0, %v2300_v19  ;;  %v737_v20 = vpop.f32.mrb[7].mxu0 }
 0x583   :  { %746 = vst.msk [vmem:[#allocation2] sm:$0xff] %vm78_vm0, %v737_v20 }
 0x589   :  { %v1317_v23 = vld [vmem:[#allocation2 + $0x8] sm:$0xff] }
 0x58a   :  { %v1321_v25 = vadd.f32 %v1317_v23, %v2910_v7  ;;  %v1316_v26 = vld [vmem:[#allocation2] sm:$0xff] }
 0x58b   :  { %v1320_v27 = vadd.f32 %v1316_v26, %v2903_v5 }
 0x58c   :  { %v3052_v28 = vadd.f32 %v3047_v22, %v1321_v25 }
 0x58d   :  { %v3055_v63 = vadd.f32 %v3047_v22, %v1320_v27 }
 0x58e   :  { %v1335_v29 = vsel %vm78_vm0, %v3052_v28, 0.0 }
 0x58f   :  { %1336 = vadd.xlane.f32.xlu0 %v1335_v29  ;;  %v1332_v30 = vsel %vm78_vm0, %v3055_v63, 0.0 }
 0x590   :  { %1333 = vadd.xlane.f32.xlu1 %v1332_v30 }
 0x5d8   :  { %v854_v31 = vpop.xlane.xlu0 %853 }
 0x5d9   :  { %2597 = vrcp.f32 %v854_v31  ;;  %v851_v7 = vpop.xlane.xlu1 %850 }
 0x5da   :  { %2599 = vrcp.f32 %v851_v7 }
 0x5e1   :  { %v1054_v32 = vpop.xlane.xlu1 %1053 }
 0x5e2   :  { %2601 = vrcp.f32 %v1054_v32 }
 0x5e3   :  { %v2598_v5 = vpop.eup %2597 }
 0x5e4   :  { %v2600_v33 = vpop.eup %2599  ;;  %v858_v34 = vmul.f32 %v2598_v5, %v2590_v3 }
 0x5e5   :  { %v2563_v35 = vpop.permute.xlu1 %2562  ;;  %v1057_v36 = vpop.xlane.xlu0 %1056  ;;  %v857_v37 = vmul.f32 %v2600_v33, %v2592_v4 }
 0x5e6   :  { %861 = vst.msk [vmem:[#allocation12 + $0x28] sm:$0xff] %vm186_vm1, %v858_v34  ;;  %v2565_v38 = vunpack.i.h.bf16 %v2563_v35  ;;  %v2564_v39 = vunpack.i.l.bf16 %v2563_v35  ;;  %2603 = vrcp.f32 %v1057_v36  ;;  %v1395_v35 = vsub.s32 6, %v2929_v11 }
 0x5e7   :  { %860 = vst.msk [vmem:[#allocation12 + $0x20] sm:$0xff] %vm186_vm1, %v857_v37  ;;  %2312 = vmatprep.mubr.msk.f32.mxu0 %vm186_vm1, %v857_v37 }
 0x5e8   :  { %v2449_v24 = vpack.c.bf16 %v2565_v38, %v2564_v39 }
 0x5e9   :  { %v2568_v41 = vpop.permute.xlu0 %2567 }
 0x5ea   :  { %v2570_v43 = vunpack.i.h.bf16 %v2568_v41  ;;  %v2569_v44 = vunpack.i.l.bf16 %v2568_v41  ;;  %2450 = vmatprep.subr.bf16.mxu0 %v2449_v24  ;;  %v1396_v41 = vrot.slane %v2932_v13, %v1395_v35 }
 0x5eb   :  { %2452 = vmatpush3.bf16.msra.mxu0 %v2449_v24 }
 0x5ec   :  { %v2602_v45 = vpop.eup %2601  ;;  %v2459_v46 = vpack.c.bf16 %v2570_v43, %v2569_v44 }
 0x5ed   :  { %v1060_v47 = vmul.f32 %v2602_v45, %v2594_v15  ;;  %v1401_v15 = vld [vmem:[#allocation3] sm:$0xff] }
 0x5ee   :  { %2313 = vmatmul.mubr.msk.f32.vlgmr.msra.gmra.mrb[8].mxu0 %vm186_vm1, %v858_v34  ;;  %2460 = vmatprep.subr.bf16.mxu0 %v2459_v46  ;;  %v1387_v34 = vsub.s32 5, %v2929_v11 }
 0x5ef   :  { %2462 = vmatpush3.bf16.msra.mxu0 %v2459_v46  ;;  %1063 = vst.msk [vmem:[#allocation12 + $0x30] sm:$0xff] %vm186_vm1, %v1060_v47  ;;  %2326 = vmatprep.mubr.msk.f32.mxu0 %vm186_vm1, %v1060_v47  ;;  %v1542_v47 = vld [vmem:[%s3264_s5] sm:$0xff] }
 0x5f0   :  { %v2604_v48 = vpop.eup %2603  ;;  %2464 = vmatprep.subr.bf16.mxu0 %v3013_v40  ;;  %v1388_v36 = vrot.slane %v2932_v13, %v1387_v34 }
 0x5f1   :  { %v1061_v49 = vmul.f32 %v2604_v48, %v2596_v17  ;;  %v1403_v17 = vld [vmem:[#allocation3 + $0x10] sm:$0xff]  ;;  %v1543_v48 = vld [vmem:[%s3264_s5 + $0x8] sm:$0xff] }
 0x5f2   :  { %v2475_v19 = vpack.c.bf16 %v1404_v18, %v1403_v17 }
 0x5f3   :  { %1064 = vst.msk [vmem:[#allocation12 + $0x38] sm:$0xff] %vm186_vm1, %v1061_v49  ;;  %2327 = vmatmul.mubr.msk.f32.vlgmr.msra.gmra.mrb[10].mxu0 %vm186_vm1, %v1061_v49  ;;  %v2479_v49 = vpack.c.bf16 %v1543_v48, %v1542_v47 }
 0x5f4   :  { %2466 = vmatpush3.bf16.msra.mxu0 %v3013_v40 }
 0x5f5   :  { %2468 = vmatprep.subr.bf16.mxu0 %v3023_v42 }
 0x61c   :  { %v1337_v55 = vpop.xlane.xlu0 %1336 }
 0x61d   :  { %v1334_v56 = vpop.xlane.xlu1 %1333  ;;  %v1346_v57 = vmul.f32 0.03125, %v1337_v55  ;;  %v1548_v55 = vld [vmem:[%s3264_s5 + $0x30] sm:$0xff] }
 0x61e   :  { %v1345_v58 = vmul.f32 0.03125, %v1334_v56  ;;  %v1549_v56 = vld [vmem:[%s3264_s5 + $0x38] sm:$0xff] }
 0x61f   :  { %v1350_v60 = vsub.f32 %v3052_v28, %v1346_v57  ;;  %v2491_v57 = vpack.c.bf16 %v1549_v56, %v1548_v55 }
 0x620   :  { %v1349_v62 = vsub.f32 %v3055_v63, %v1345_v58 }
 0x621   :  { %v1354_v4 = vmul.f32 %v1350_v60, %v1350_v60 }
 0x622   :  { %v1353_v12 = vmul.f32 %v1349_v62, %v1349_v62 }
 0x623   :  { %v1360_v14 = vsel %vm78_vm0, %v1354_v4, 0.0 }
 0x6c1   :  { %v2314_v50 = vpop.f32.mrb[8].mxu0 }
 0x6c2   :  { %v940_v51 = vpop.f32.mrb[9].mxu0 }
 0x6c6   :  { %v2328_v52 = vpop.f32.mrb[10].mxu0 }
 0x6c7   :  { %v1143_v53 = vpop.f32.mrb[11].mxu0 }
 0x6c8   :  { %2333 = vmatprep.mubr.msk.f32.mxu0 %vm186_vm1, %v1143_v53 }
 0x6c9   :  { %2334 = vmatmul.mubr.msk.f32.vlgmr.msra.gmra.mrb[12].mxu0 %vm186_vm1, %v2328_v52  ;;  %v1546_v52 = vld [vmem:[%s3264_s5 + $0x20] sm:$0xff] }
 0x6ca   :  { %2470 = vmatpush3.bf16.msra.mxu0 %v3023_v42  ;;  %2340 = vmatprep.mubr.msk.f32.mxu0 %vm186_vm1, %v940_v51  ;;  %v1545_v51 = vld [vmem:[%s3264_s5 + $0x18] sm:$0xff] }
 0x6cb   :  { %2480 = vmatprep.subr.bf16.mxu0 %v2479_v49 }
 0x6d1   :  { %2341 = vmatmul.mubr.msk.f32.vlgmr.msra.gmra.mrb[12].mxu0 %vm186_vm1, %v2314_v50  ;;  %v1544_v50 = vld [vmem:[%s3264_s5 + $0x10] sm:$0xff] }
 0x6d2   :  { %v2483_v53 = vpack.c.bf16 %v1545_v51, %v1544_v50  ;;  %2482 = vmatpush3.bf16.msra.mxu0 %v2479_v49 }
 0x6d4   :  { %2484 = vmatprep.subr.bf16.mxu0 %v2483_v53 }
 0x6d6   :  { %2486 = vmatpush3.bf16.msra.mxu0 %v2483_v53 }
 0x7a4   :  { %v2342_v54 = vpop.f32.mrb[12].mxu0 }
 0x7a5   :  { %1315 = vst.msk [vmem:[#allocation2 + $0x18] sm:$0xff] %vm78_vm0, %v2342_v54  ;;  %v1305_v40 = vpop.f32.mrb[13].mxu0  ;;  %v1547_v54 = vld [vmem:[%s3264_s5 + $0x28] sm:$0xff] }
 0x7a6   :  { %1314 = vst.msk [vmem:[#allocation2 + $0x10] sm:$0xff] %vm78_vm0, %v1305_v40  ;;  %v2487_v40 = vpack.c.bf16 %v1547_v54, %v1546_v52 }
 0x7a8   :  { %2488 = vmatprep.subr.bf16.mxu0 %v2487_v40 }
 0x7a9   :  { %2490 = vmatpush3.bf16.msra.mxu0 %v2487_v40 }
 0x7aa   :  { %2492 = vmatprep.subr.bf16.mxu0 %v2491_v57 }
 0x7ac   :  { %v1319_v59 = vld [vmem:[#allocation2 + $0x18] sm:$0xff] }
 0x7ad   :  { %v1323_v61 = vadd.f32 %v1319_v59, %v2922_v9  ;;  %v1318_v42 = vld [vmem:[#allocation2 + $0x10] sm:$0xff]  ;;  %v1357_v9 = vsel %vm78_vm0, %v1353_v12, 0.0  ;;  %2494 = vmatpush3.bf16.msra.mxu0 %v2491_v57 }
 0x7ae   :  { %v1322_v0 = vadd.f32 %v1318_v42, %v2917_v8  ;;  %v1402_v8 = vld [vmem:[#allocation3 + $0x8] sm:$0xff] }
 0x7af   :  { %v1331_v1 = vadd.f32 %v3047_v22, %v1323_v61  ;;  %v2471_v16 = vpack.c.bf16 %v1402_v8, %v1401_v15 }
 0x7b0   :  { %v1330_v2 = vadd.f32 %v3047_v22, %v1322_v0 }
 0x7b1   :  { %v1341_v3 = vsel %vm78_vm0, %v1331_v1, 0.0  ;;  %2472 = vmatprep.subr.bf16.mxu1 %v2471_v16 }
 0x7b2   :  { %1342 = vadd.xlane.f32.xlu0 %v1341_v3  ;;  %v1338_v6 = vsel %vm78_vm0, %v1330_v2, 0.0  ;;  %2474 = vmatpush3.bf16.msra.mxu1 %v2471_v16 }
 0x7b3   :  { %1339 = vadd.xlane.f32.xlu1 %v1338_v6  ;;  %2476 = vmatprep.subr.bf16.mxu1 %v2475_v19 }
 0x7b6   :  { %1361 = vadd.xlane.f32.xlu0 %v1360_v14  ;;  %2478 = vmatpush3.bf16.msra.mxu1 %v2475_v19 }
 0x7b7   :  { %1358 = vadd.xlane.f32.xlu1 %v1357_v9  ;;  %v1407_v9 = vsub.s32 2, %v2929_v11 }
 0x7b9   :  { %v1408_v15 = vrot.slane %v2932_v13, %v1407_v9 }
 0x83f   :  { %v1343_v20 = vpop.xlane.xlu0 %1342 }
 0x840   :  { %v1348_v21 = vmul.f32 0.03125, %v1343_v20  ;;  %v1340_v22 = vpop.xlane.xlu1 %1339 }
 0x841   :  { %v1347_v23 = vmul.f32 0.03125, %v1340_v22 }
 0x842   :  { %v1352_v25 = vsub.f32 %v1331_v1, %v1348_v21 }
 0x843   :  { %v1351_v26 = vsub.f32 %v1330_v2, %v1347_v23  ;;  %v1362_v27 = vpop.xlane.xlu0 %1361 }
 0x844   :  { %v1370_v28 = vmul.f32 0.03125, %v1362_v27  ;;  %v1359_v63 = vpop.xlane.xlu1 %1358  ;;  %v1356_v29 = vmul.f32 %v1352_v25, %v1352_v25 }
 0x845   :  { %v1369_v30 = vmul.f32 0.03125, %v1359_v63  ;;  %v1355_v31 = vmul.f32 %v1351_v26, %v1351_v26 }
 0x846   :  { %v1374_v7 = vadd.f32 1e-12, %v1370_v28  ;;  %v1366_v32 = vsel %vm78_vm0, %v1356_v29, 0.0 }
 0x847   :  { %v1373_v5 = vadd.f32 1e-12, %v1369_v30  ;;  %1367 = vadd.xlane.f32.xlu0 %v1366_v32  ;;  %v1363_v33 = vsel %vm78_vm0, %v1355_v31, 0.0 }
 0x848   :  { %2605 = vrsqrt.f32 %v1374_v7  ;;  %1364 = vadd.xlane.f32.xlu1 %v1363_v33 }
 0x849   :  { %2607 = vrsqrt.f32 %v1373_v5 }
 0x852   :  { %v2606_v37 = vpop.eup %2605 }
 0x853   :  { %v2608_v38 = vpop.eup %2607  ;;  %v1382_v39 = vmul.f32 %v2606_v37, %v1350_v60 }
 0x854   :  { %v1381_v24 = vmul.f32 %v2608_v38, %v1349_v62 }
 0x855   :  { %v1390_v43 = vmul.f32 %v1388_v36, %v1382_v39 }
 0x856   :  { %v1389_v44 = vmul.f32 %v1388_v36, %v1381_v24 }
 0x857   :  { %v3097_v46 = vadd.f32 %v1396_v41, %v1390_v43 }
 0x858   :  { %v3095_v45 = vadd.f32 %v1396_v41, %v1389_v44 }
 0x85a   :  { %2351 = vmatprep.mubr.msk.f32.mxu1 %vm78_vm0, %v3095_v45 }
 0x85b   :  { %2352 = vmatmul.mubr.msk.f32.vlgmr.msra.gmra.mrb[10].mxu1 %vm78_vm0, %v3097_v46 }
 0x8d4   :  { %v1368_v58 = vpop.xlane.xlu0 %1367 }
 0x8d5   :  { %v1372_v59 = vmul.f32 0.03125, %v1368_v58  ;;  %v1365_v60 = vpop.xlane.xlu1 %1364 }
 0x8d6   :  { %v1371_v61 = vmul.f32 0.03125, %v1365_v60 }
 0x8d7   :  { %v1376_v42 = vadd.f32 1e-12, %v1372_v59  ;;  %v1552_v59 = vsub.s32 3, %v2929_v11 }
 0x8d8   :  { %v1375_v62 = vadd.f32 1e-12, %v1371_v61 }
 0x8d9   :  { %2609 = vrsqrt.f32 %v1376_v42  ;;  %v1553_v60 = vrot.slane %v2932_v13, %v1552_v59  ;;  %v2789_v59 = vmov 0.0|0.0  }
 0x8da   :  { %2611 = vrsqrt.f32 %v1375_v62 }
 0x8e3   :  { %v2610_v0 = vpop.eup %2609 }
 0x8e4   :  { %v2612_v1 = vpop.eup %2611  ;;  %v1384_v2 = vmul.f32 %v2610_v0, %v1352_v25 }
 0x8e5   :  { %v1383_v3 = vmul.f32 %v2612_v1, %v1351_v26 }
 0x8e6   :  { %v1392_v4 = vmul.f32 %v1388_v36, %v1384_v2 }
 0x8e7   :  { %v1391_v6 = vmul.f32 %v1388_v36, %v1383_v3 }
 0x8e8   :  { %v3129_v14 = vadd.f32 %v1396_v41, %v1392_v4 }
 0x8e9   :  { %v3127_v12 = vadd.f32 %v1396_v41, %v1391_v6 }
 0x8eb   :  { %2354 = vmatprep.mubr.msk.f32.mxu1 %vm78_vm0, %v3127_v12 }
 0x8ec   :  { %2355 = vmatmul.mubr.msk.f32.gmra.mrb[12].mxu1 %vm78_vm0, %v3129_v14 }
 0x92e   :  { %v2353_v8 = vpop.f32.mrb[10].mxu1 }
 0x92f   :  { %v1493_v16 = vadd.f32 %v2353_v8, %v1408_v15  ;;  %v1487_v17 = vpop.f32.mrb[11].mxu1 }
 0x930   :  { %v1488_v18 = vadd.f32 %v1487_v17, %v1408_v15 }
 0x931   :  { %v1511_v19 = vmul.f32 0.044715, %v1493_v16  ;;  %v1507_v5 = vmul.f32 0.5, %v1493_v16 }
 0x932   :  { %v1510_v20 = vmul.f32 0.044715, %v1488_v18  ;;  %v1506_v7 = vmul.f32 0.5, %v1488_v18 }
 0x933   :  { %v1515_v21 = vmul.f32 %v1511_v19, %v1493_v16 }
 0x934   :  { %v1514_v22 = vmul.f32 %v1510_v20, %v1488_v18 }
 0x935   :  { %v1519_v23 = vmul.f32 %v1515_v21, %v1493_v16 }
 0x936   :  { %v1518_v25 = vmul.f32 %v1514_v22, %v1488_v18 }
 0x937   :  { %v1523_v26 = vadd.f32 %v1519_v23, %v1493_v16 }
 0x938   :  { %v1522_v27 = vadd.f32 %v1518_v25, %v1488_v18 }
 0x939   :  { %v1527_v28 = vmul.f32 0.7978846, %v1523_v26 }
 0x93a   :  { %v1526_v63 = vmul.f32 0.7978846, %v1522_v27 }
 0x93b   :  { %2613 = vtanh.f32 %v1527_v28 }
 0x93c   :  { %2615 = vtanh.f32 %v1526_v63 }
 0x945   :  { %v2614_v29 = vpop.eup %2613 }
 0x946   :  { %v2616_v30 = vpop.eup %2615  ;;  %v1535_v31 = vadd.f32 1.0, %v2614_v29  ;;  %v1730_v29 = vld [vmem:[%s3265_s6 + $0x10] sm:$0xff] }
 0x947   :  { %v1534_v32 = vadd.f32 1.0, %v2616_v30  ;;  %v1731_v30 = vld [vmem:[%s3265_s6 + $0x18] sm:$0xff] }
 0x948   :  { %v1539_v34 = vmul.f32 %v1535_v31, %v1507_v5  ;;  %v2499_v31 = vpack.c.bf16 %v1731_v30, %v1730_v29 }
 0x949   :  { %v1538_v33 = vmul.f32 %v1534_v32, %v1506_v7 }
 0x94b   :  { %2373 = vmatprep.mubr.msk.f32.mxu0 %vm1554_vm3, %v1538_v33 }
 0x94c   :  { %2374 = vmatmul.mubr.msk.f32.vlgmr.msra.gmra.mrb[14].mxu0 %vm1554_vm3, %v1539_v34 }
 0x9bf   :  { %v2356_v35 = vpop.f32.mrb[12].mxu1 }
 0x9c0   :  { %v1503_v36 = vadd.f32 %v2356_v35, %v1408_v15  ;;  %v1497_v37 = vpop.f32.mrb[13].mxu1 }
 0x9c1   :  { %v1498_v38 = vadd.f32 %v1497_v37, %v1408_v15 }
 0x9c2   :  { %v1513_v39 = vmul.f32 0.044715, %v1503_v36  ;;  %v1509_v56 = vmul.f32 0.5, %v1503_v36 }
 0x9c3   :  { %v1512_v24 = vmul.f32 0.044715, %v1498_v38  ;;  %v1508_v40 = vmul.f32 0.5, %v1498_v38 }
 0x9c4   :  { %v1517_v41 = vmul.f32 %v1513_v39, %v1503_v36 }
 0x9c5   :  { %v1516_v43 = vmul.f32 %v1512_v24, %v1498_v38 }
 0x9c6   :  { %v1521_v44 = vmul.f32 %v1517_v41, %v1503_v36 }
 0x9c7   :  { %v1520_v47 = vmul.f32 %v1516_v43, %v1498_v38 }
 0x9c8   :  { %v1525_v48 = vadd.f32 %v1521_v44, %v1503_v36 }
 0x9c9   :  { %v1524_v49 = vadd.f32 %v1520_v47, %v1498_v38 }
 0x9ca   :  { %v1529_v50 = vmul.f32 0.7978846, %v1525_v48 }
 0x9cb   :  { %v1528_v51 = vmul.f32 0.7978846, %v1524_v49  ;;  %v1710_v49 = vsub.s32 7, %v2929_v11 }
 0x9cc   :  { %2617 = vtanh.f32 %v1529_v50 }
 0x9cd   :  { %2619 = vtanh.f32 %v1528_v51  ;;  %v1711_v50 = vrot.slane %v2932_v13, %v1710_v49  ;;  %v1875_v13 = vld [vmem:[%s3260_s1] sm:$0xff]  ;;  %s2794_s1 = smov [#allocation8]  }
 0x9ce   :  { %s2042_s14 = sshll.u32 %s2794_s1, 4  ;;  %s2043_s14 = int_to_ptr.vmem [resolvable:$true] %s2042_s14 }
 0x9cf   :  { %s2682_s15 = scalar_lea.vmem %s2043_s14, 512  ;;  %p2687_p3 = scmp.lt.s32.totalorder %s2043_s14, %s2043_s14 }
 0x9d0   :  { %p2683_p2 = scmp.ne.s32.totalorder %s2043_s14, %s2682_s15  ;;  %p2688_p4 = scmp.lt.s32.totalorder %s2682_s15, %s2682_s15 }
 0x9d2   :  { %p2689_p5 = por %p2688_p4, %p2687_p3 }
 0x9d4   :  { %p2690_p6 = pnand %p2689_p5, %p2683_p2 }
 0x9d6   :  { %v2618_v52 = vpop.eup %2617 }
 0x9d7   :  { %v2620_v53 = vpop.eup %2619  ;;  %v1537_v54 = vadd.f32 1.0, %v2618_v52 }
 0x9d8   :  { %v1536_v55 = vadd.f32 1.0, %v2620_v53 }
 0x9d9   :  { %v1541_v58 = vmul.f32 %v1537_v54, %v1509_v56  ;;  %v2146_v54 = vld [vmem:[#allocation6 + $0x8] ss:$0 sm:$0xff] }
 0x9da   :  { %v1540_v57 = vmul.f32 %v1536_v55, %v1508_v40 }
 0x9dc   :  { %2376 = vmatprep.mubr.msk.f32.mxu0 %vm1554_vm3, %v1540_v57 }
 0x9dd   :  { %2377 = vmatmul.mubr.msk.f32.gmra.mrb[16].mxu0 %vm1554_vm3, %v1541_v58 }
 0xa1f   :  { %v2375_v61 = vpop.f32.mrb[14].mxu0 }
 0xa20   :  { %v1639_v42 = vadd.f32 %v2375_v61, %v1553_v60  ;;  %v1633_v62 = vpop.f32.mrb[15].mxu0  ;;  %v2791_v61 = vmov 1  }
 0xa21   :  { %v1634_v0 = vadd.f32 %v1633_v62, %v1553_v60  ;;  %2572 = vset.pattern.permute.xlu0 %v2791_v61 }
 0xa22   :  { %v1653_v1 = vadd.f32 %v1639_v42, %v3097_v46 }
 0xa23   :  { %v1652_v2 = vadd.f32 %v1634_v0, %v3095_v45 }
 0xa24   :  { %v1659_v3 = vsel %vm78_vm0, %v1653_v1, 0.0 }
 0xa25   :  { %1660 = vadd.xlane.f32.xlu0 %v1659_v3  ;;  %v1656_v4 = vsel %vm78_vm0, %v1652_v2, 0.0 }
 0xa26   :  { %1657 = vadd.xlane.f32.xlu1 %v1656_v4 }
 0xab0   :  { %v2378_v6 = vpop.f32.mrb[16].mxu0 }
 0xab1   :  { %v1649_v9 = vadd.f32 %v2378_v6, %v1553_v60  ;;  %v1643_v15 = vpop.f32.mrb[17].mxu0 }
 0xab2   :  { %v1644_v8 = vadd.f32 %v1643_v15, %v1553_v60  ;;  %v1661_v16 = vpop.xlane.xlu0 %1660  ;;  %v2790_v60 = vmov 0  }
 0xab3   :  { %v1669_v17 = vmul.f32 0.03125, %v1661_v16  ;;  %v1658_v18 = vpop.xlane.xlu1 %1657  ;;  %v1655_v19 = vadd.f32 %v1649_v9, %v3129_v14  ;;  %v1729_v14 = vld [vmem:[%s3265_s6 + $0x8] sm:$0xff]  ;;  %2571 = vset.pattern.permute.xlu1 %v2790_v60 }
 0xab4   :  { %v1668_v20 = vmul.f32 0.03125, %v1658_v18  ;;  %v1654_v46 = vadd.f32 %v1644_v8, %v3127_v12  ;;  %v1728_v12 = vld [vmem:[%s3265_s6] sm:$0xff] }
 0xab5   :  { %v1673_v21 = vsub.f32 %v1653_v1, %v1669_v17  ;;  %v1665_v45 = vsel %vm78_vm0, %v1655_v19, 0.0  ;;  %v2495_v63 = vpack.c.bf16 %v1729_v14, %v1728_v12 }
 0xab6   :  { %v1672_v22 = vsub.f32 %v1652_v2, %v1668_v20  ;;  %1666 = vadd.xlane.f32.xlu0 %v1665_v45  ;;  %v1662_v23 = vsel %vm78_vm0, %v1654_v46, 0.0  ;;  %v2637_v20 = vld [vmem:[#allocation6] sm:$0xff] }
 0xab7   :  { %1663 = vadd.xlane.f32.xlu1 %v1662_v23  ;;  %v1677_v25 = vmul.f32 %v1673_v21, %v1673_v21  ;;  %2496 = vmatprep.subr.bf16.mxu1 %v2495_v63 }
 0xab8   :  { %v1676_v26 = vmul.f32 %v1672_v22, %v1672_v22  ;;  %2498 = vmatpush3.bf16.msra.mxu1 %v2495_v63 }
 0xab9   :  { %v1683_v27 = vsel %vm78_vm0, %v1677_v25, 0.0  ;;  %2500 = vmatprep.subr.bf16.mxu1 %v2499_v31 }
 0xaba   :  { %1684 = vadd.xlane.f32.xlu0 %v1683_v27  ;;  %v1680_v28 = vsel %vm78_vm0, %v1676_v26, 0.0 }
 0xabb   :  { %1681 = vadd.xlane.f32.xlu1 %v1680_v28 }
 0xabc   :  { %2502 = vmatpush3.bf16.msra.mxu1 %v2499_v31 }
 0xabd   :  { %2503 = vmatprep.subr.bf16.mxu1 %v2789_v59 }
 0xb43   :  { %v1667_v7 = vpop.xlane.xlu0 %1666 }
 0xb44   :  { %v1671_v32 = vmul.f32 0.03125, %v1667_v7  ;;  %v1664_v5 = vpop.xlane.xlu1 %1663 }
 0xb45   :  { %v1670_v33 = vmul.f32 0.03125, %v1664_v5 }
 0xb46   :  { %v1675_v34 = vsub.f32 %v1655_v19, %v1671_v32  ;;  %v1734_v19 = vsub.s32 4, %v2929_v11 }
 0xb47   :  { %v1674_v35 = vsub.f32 %v1654_v46, %v1670_v33  ;;  %v1685_v36 = vpop.xlane.xlu0 %1684 }
 0xb48   :  { %v1693_v37 = vmul.f32 0.03125, %v1685_v36  ;;  %v1682_v38 = vpop.xlane.xlu1 %1681  ;;  %v1679_v39 = vmul.f32 %v1675_v34, %v1675_v34  ;;  %v1735_v46 = vrot.slane %v2637_v20, %v1734_v19 }
 0xb49   :  { %v1692_v24 = vmul.f32 0.03125, %v1682_v38  ;;  %v1678_v41 = vmul.f32 %v1674_v35, %v1674_v35  ;;  %v1874_v38 = vand.u32 127, %v74_v10 }
 0xb4a   :  { %v1697_v43 = vadd.f32 1e-12, %v1693_v37  ;;  %v1689_v44 = vsel %vm78_vm0, %v1679_v39, 0.0 }
 0xb4b   :  { %v1696_v47 = vadd.f32 1e-12, %v1692_v24  ;;  %1690 = vadd.xlane.f32.xlu0 %v1689_v44  ;;  %v1686_v48 = vsel %vm78_vm0, %v1678_v41, 0.0  ;;  %v2793_v24 = vmov 0.0  }
 0xb4c   :  { %2621 = vrsqrt.f32 %v1697_v43  ;;  %1687 = vadd.xlane.f32.xlu1 %v1686_v48 }
 0xb4d   :  { %2623 = vrsqrt.f32 %v1696_v47 }
 0xb56   :  { %v2622_v51 = vpop.eup %2621 }
 0xb57   :  { %v2624_v52 = vpop.eup %2623  ;;  %v1705_v53 = vmul.f32 %v2622_v51, %v1673_v21 }
 0xb58   :  { %v1704_v40 = vmul.f32 %v2624_v52, %v1672_v22 }
 0xb59   :  { %v1713_v55 = vmul.f32 %v1711_v50, %v1705_v53 }
 0xb5a   :  { %v1712_v56 = vmul.f32 %v1711_v50, %v1704_v40 }
 0xb5b   :  { %v1721_v57 = vadd.f32 %v2146_v54, %v1713_v55 }
 0xb5c   :  { %v1720_v58 = vadd.f32 %v2146_v54, %v1712_v56 }
 0xb5d   :  { %1725 = vst.msk [vmem:[#allocation11 + $0x8] sm:$0xff] %vm78_vm0, %v1721_v57  ;;  %1877 = vperm.xlu1 %2571, %v1875_v13  }
 0xb5e   :  { %2387 = vmatprep.mubr.msk.f32.mxu1 %vm78_vm0, %v1720_v58  ;;  %1724 = vst.msk [vmem:[#allocation11] sm:$0xff] %vm78_vm0, %v1720_v58 }
 0xb5f   :  { %2388 = vmatmul.mubr.msk.f32.vlgmr.msra.gmra.mrb[14].mxu1 %vm78_vm0, %v1721_v57 }
 0xb61   :  { %1957 = vperm.xlu0 %2572, %v1875_v13  }
 0xbd8   :  { %v1691_v42 = vpop.xlane.xlu0 %1690 }
 0xbd9   :  { %v1695_v62 = vmul.f32 0.03125, %v1691_v42  ;;  %v1688_v0 = vpop.xlane.xlu1 %1687 }
 0xbda   :  { %v1694_v1 = vmul.f32 0.03125, %v1688_v0 }
 0xbdb   :  { %v1699_v2 = vadd.f32 1e-12, %v1695_v62 }
 0xbdc   :  { %v1698_v3 = vadd.f32 1e-12, %v1694_v1 }
 0xbdd   :  { %2625 = vrsqrt.f32 %v1699_v2  ;;  %v1878_v39 = vpop.permute.xlu1 %1877 }
 0xbde   :  { %2627 = vrsqrt.f32 %v1698_v3  ;;  %vm1879_vm5 = vcmp.eq.s32.totalorder %v1874_v38, %v1878_v39 }
 0xbdf   :  { %v2151_v43 = vsel %vm1879_vm5, 1.0, %v2793_v24 }
 0xbe0   :  { %v1958_v41 = vpop.permute.xlu0 %1957 }
 0xbe1   :  { %vm1959_vm6 = vcmp.eq.s32.totalorder %v1874_v38, %v1958_v41 }
 0xbe2   :  { %v2153_v44 = vsel %vm1959_vm6, 1.0, %v2793_v24 }
 0xbe7   :  { %v2626_v4 = vpop.eup %2625 }
 0xbe8   :  { %v2628_v6 = vpop.eup %2627  ;;  %v1707_v9 = vmul.f32 %v2626_v4, %v1675_v34 }
 0xbe9   :  { %v1706_v15 = vmul.f32 %v2628_v6, %v1674_v35 }
 0xbea   :  { %v1715_v8 = vmul.f32 %v1711_v50, %v1707_v9 }
 0xbeb   :  { %v1714_v16 = vmul.f32 %v1711_v50, %v1706_v15 }
 0xbec   :  { %v1723_v17 = vadd.f32 %v2146_v54, %v1715_v8 }
 0xbed   :  { %v1722_v18 = vadd.f32 %v2146_v54, %v1714_v16 }
 0xbee   :  { %1727 = vst.msk [vmem:[#allocation11 + $0x18] sm:$0xff] %vm78_vm0, %v1723_v17 }
 0xbef   :  { %2390 = vmatprep.mubr.msk.f32.mxu1 %vm78_vm0, %v1722_v18  ;;  %1726 = vst.msk [vmem:[#allocation11 + $0x10] sm:$0xff] %vm78_vm0, %v1722_v18 }
 0xbf0   :  { %2391 = vmatmul.mubr.msk.f32.gmra.mrb[16].mxu1 %vm78_vm0, %v1723_v17 }
 0xbf1   :  { %2397 = vmatprep.mubr.msk.f32.mxu1 %vm2792_vm4, %v2793_v24 }
 0xc32   :  { %v2389_v21 = vpop.f32.mrb[14].mxu1 }
 0xc33   :  { %v1820_v45 = vadd.f32 %v2389_v21, %v1735_v46  ;;  %v1814_v22 = vpop.f32.mrb[15].mxu1 }
 0xc34   :  { %v1815_v23 = vadd.f32 %v1814_v22, %v1735_v46 }
 0xc35   :  { %v1838_v25 = vmul.f32 0.044715, %v1820_v45  ;;  %v1834_v32 = vmul.f32 0.5, %v1820_v45 }
 0xc36   :  { %v1837_v26 = vmul.f32 0.044715, %v1815_v23  ;;  %v1833_v33 = vmul.f32 0.5, %v1815_v23 }
 0xc37   :  { %v1842_v27 = vmul.f32 %v1838_v25, %v1820_v45 }
 0xc38   :  { %v1841_v28 = vmul.f32 %v1837_v26, %v1815_v23 }
 0xc39   :  { %v1846_v12 = vmul.f32 %v1842_v27, %v1820_v45 }
 0xc3a   :  { %v1845_v14 = vmul.f32 %v1841_v28, %v1815_v23 }
 0xc3b   :  { %v1850_v63 = vadd.f32 %v1846_v12, %v1820_v45 }
 0xc3c   :  { %v1849_v29 = vadd.f32 %v1845_v14, %v1815_v23 }
 0xc3d   :  { %v1854_v30 = vmul.f32 0.7978846, %v1850_v63 }
 0xc3e   :  { %v1853_v31 = vmul.f32 0.7978846, %v1849_v29 }
 0xc3f   :  { %2629 = vtanh.f32 %v1854_v30 }
 0xc40   :  { %2631 = vtanh.f32 %v1853_v31 }
 0xc49   :  { %v2630_v7 = vpop.eup %2629 }
 0xc4a   :  { %v2632_v11 = vpop.eup %2631  ;;  %v1862_v5 = vadd.f32 1.0, %v2630_v7 }
 0xc4b   :  { %v1861_v34 = vadd.f32 1.0, %v2632_v11 }
 0xc4c   :  { %v1866_v35 = vmul.f32 %v1862_v5, %v1834_v32 }
 0xc4d   :  { %v1865_v36 = vmul.f32 %v1861_v34, %v1833_v33 }
 0xc4e   :  { %1870 = vst.msk [vmem:[#allocation8 + $0x8] sm:$0xff] %vm78_vm0, %v1866_v35 }
 0xc4f   :  { %v2504_v37 = vpack.c.bf16 %v1866_v35, %v1865_v36  ;;  %1869 = vst.msk [vmem:[#allocation8] sm:$0xff] %vm78_vm0, %v1865_v36 }
 0xc51   :  { %2505 = vmatpush3.bf16.msra.mxu1 %v2504_v37 }
 0xc52   :  { %2506 = vmatprep.subr.bf16.mxu1 %v2789_v59 }
 0xc54   :  { %2398 = vmatmul.mubr.msk.f32.vlgmr.msra.gmra.mrb[18].mxu1 %vm186_vm1, %v2151_v43 }
 0xc55   :  { %2404 = vmatprep.mubr.msk.f32.mxu1 %vm2792_vm4, %v2793_v24 }
 0xcc3   :  { %v2392_v47 = vpop.f32.mrb[16].mxu1 }
 0xcc4   :  { %v1830_v48 = vadd.f32 %v2392_v47, %v1735_v46  ;;  %v1824_v49 = vpop.f32.mrb[17].mxu1 }
 0xcc5   :  { %v1825_v50 = vadd.f32 %v1824_v49, %v1735_v46 }
 0xcc6   :  { %v1840_v51 = vmul.f32 0.044715, %v1830_v48  ;;  %v1836_v60 = vmul.f32 0.5, %v1830_v48 }
 0xcc7   :  { %v1839_v10 = vmul.f32 0.044715, %v1825_v50  ;;  %v1835_v42 = vmul.f32 0.5, %v1825_v50 }
 0xcc8   :  { %v1844_v52 = vmul.f32 %v1840_v51, %v1830_v48 }
 0xcc9   :  { %v1843_v53 = vmul.f32 %v1839_v10, %v1825_v50 }
 0xcca   :  { %v1848_v54 = vmul.f32 %v1844_v52, %v1830_v48 }
 0xccb   :  { %v1847_v40 = vmul.f32 %v1843_v53, %v1825_v50 }
 0xccc   :  { %v1852_v55 = vadd.f32 %v1848_v54, %v1830_v48 }
 0xccd   :  { %v1851_v56 = vadd.f32 %v1847_v40, %v1825_v50 }
 0xcce   :  { %v1856_v57 = vmul.f32 0.7978846, %v1852_v55 }
 0xccf   :  { %v1855_v58 = vmul.f32 0.7978846, %v1851_v56 }
 0xcd0   :  { %2633 = vtanh.f32 %v1856_v57 }
 0xcd1   :  { %2635 = vtanh.f32 %v1855_v58 }
 0xcda   :  { %v2634_v59 = vpop.eup %2633 }
 0xcdb   :  { %v2636_v13 = vpop.eup %2635  ;;  %v1864_v61 = vadd.f32 1.0, %v2634_v59 }
 0xcdc   :  { %v1863_v62 = vadd.f32 1.0, %v2636_v13 }
 0xcdd   :  { %v1868_v0 = vmul.f32 %v1864_v61, %v1836_v60 }
 0xcde   :  { %v1867_v1 = vmul.f32 %v1863_v62, %v1835_v42 }
 0xcdf   :  { %1872 = vst.msk [vmem:[#allocation8 + $0x18] sm:$0xff] %vm78_vm0, %v1868_v0 }
 0xce0   :  { %v2507_v2 = vpack.c.bf16 %v1868_v0, %v1867_v1  ;;  %1871 = vst.msk [vmem:[#allocation8 + $0x10] sm:$0xff] %vm78_vm0, %v1867_v1 }
 0xce2   :  { %2508 = vmatpush3.bf16.msra.mxu1 %v2507_v2 }
 0xce5   :  { %2405 = vmatmul.mubr.msk.f32.vlgmr.msra.gmra.mrb[20].mxu1 %vm186_vm1, %v2153_v44 }
 0xd27   :  { %v1951_v3 = vpop.f32.mrb[18].mxu1 }
 0xd28   :  { %1955 = vst.msk [vmem:[#allocation9] sm:$0xff] %vm78_vm0, %v1951_v3  ;;  %v2399_v4 = vpop.f32.mrb[19].mxu1 }
 0xd29   :  { %2693 = shalt.err (!%p2690_p6)
}
 0xd2a   :  { %s2694_s17 = scalar_lea.hbm %s3267_s8, 512 }
 0xd2b   :  { %p2695_p7 = scmp.ne.s32.totalorder %s3267_s8, %s2694_s17  ;;  %p2698_p8 = scmp.lt.u32.totalorder %s2694_s17, %s3267_s8 }
 0xd2d   :  { %p2700_p9 = pnand %p2698_p8, %p2695_p7 }
 0xd2f   :  { %2703 = shalt.err (!%p2700_p9)
}
 0xd30   :  { %2048 = dma.vmem_to_hbm [thread:$0]  %s2043_s14, 512, %s3267_s8, [#allocation5], %s2781_s27, %s2781_s27, %s2782_s28  }
 0xd31   :  { %s2795_s18 = smov [#allocation12]  }
 0xd32   :  { %s2078_s23 = sshll.u32 %s2795_s18, 4  ;;  %s2079_s23 = int_to_ptr.vmem [resolvable:$true] %s2078_s23 }
 0xd33   :  { %s2704_s24 = scalar_lea.vmem %s2079_s23, 1024  ;;  %p2709_p11 = scmp.lt.s32.totalorder %s2079_s23, %s2079_s23 }
 0xd34   :  { %p2705_p10 = scmp.ne.s32.totalorder %s2079_s23, %s2704_s24  ;;  %p2710_p12 = scmp.lt.s32.totalorder %s2704_s24, %s2704_s24 }
 0xd36   :  { %p2711_p13 = por %p2710_p12, %p2709_p11 }
 0xd38   :  { %p2712_p0 = pnand %p2711_p13, %p2705_p10 }
 0xd3a   :  { %2715 = shalt.err (!%p2712_p0)
}
 0xd3b   :  { %s2716_s26 = scalar_lea.hbm %s3270_s11, 1024 }
 0xd3c   :  { %p2717_p1 = scmp.ne.s32.totalorder %s3270_s11, %s2716_s26  ;;  %p2720_p2 = scmp.lt.u32.totalorder %s2716_s26, %s3270_s11 }
 0xd3e   :  { %p2722_p3 = pnand %p2720_p2, %p2717_p1 }
 0xd40   :  { %2725 = shalt.err (!%p2722_p3)
}
 0xd41   :  { %2084 = dma.vmem_to_hbm [thread:$0]  %s2079_s23, 1024, %s3270_s11, [#allocation13], %s2781_s27, %s2781_s27, %s2782_s28  }
 0xd42   :  { %s2796_s6 = smov [#allocation9]   ;;  %s2797_s1 = smov [#allocation11]  }
 0xd43   :  { %s2054_s13 = sshll.u32 %s2796_s6, 4  ;;  %s2066_s14 = sshll.u32 %s2797_s1, 4  ;;  %s2055_s13 = int_to_ptr.vmem [resolvable:$true] %s2054_s13  ;;  %s3221_s14 = int_to_ptr.vmem [resolvable:$true] %s2066_s14 }
 0xd44   :  { %s2726_s15 = scalar_lea.vmem %s2055_s13, 256  ;;  %p2731_p5 = scmp.lt.s32.totalorder %s2055_s13, %s2055_s13 }
 0xd45   :  { %p2727_p4 = scmp.ne.s32.totalorder %s2055_s13, %s2726_s15  ;;  %p2732_p6 = scmp.lt.s32.totalorder %s2726_s15, %s2726_s15 }
 0xd47   :  { %p2733_p7 = por %p2732_p6, %p2731_p5 }
 0xd49   :  { %p2734_p8 = pnand %p2733_p7, %p2727_p4 }
 0xdb8   :  { %v2031_v6 = vpop.f32.mrb[20].mxu1 }
 0xdb9   :  { %2036 = vst.msk [vmem:[#allocation9 + $0x8] sm:$0xff] %vm78_vm0, %v2031_v6  ;;  %v2406_v9 = vpop.f32.mrb[21].mxu1 }
 0xdba   :  { %2737 = shalt.err (!%p2734_p8)
}
 0xdbb   :  { %s2738_s2 = scalar_lea.hbm %s3268_s9, 256 }
 0xdbc   :  { %p2739_p9 = scmp.ne.s32.totalorder %s3268_s9, %s2738_s2  ;;  %p2742_p10 = scmp.lt.u32.totalorder %s2738_s2, %s3268_s9 }
 0xdbe   :  { %p2744_p11 = pnand %p2742_p10, %p2739_p9 }
 0xdc0   :  { %2747 = shalt.err (!%p2744_p11)
}
 0xdc1   :  { %2060 = dma.vmem_to_hbm [thread:$0]  %s2055_s13, 256, %s3268_s9, [#allocation10], %s2781_s27, %s2781_s27, %s2782_s28  }
 0xdc2   :  { %s2748_s4 = scalar_lea.vmem %s3221_s14, 512  ;;  %p2753_p13 = scmp.lt.s32.totalorder %s3221_s14, %s3221_s14 }
 0xdc3   :  { %p2749_p12 = scmp.ne.s32.totalorder %s3221_s14, %s2748_s4  ;;  %p2754_p0 = scmp.lt.s32.totalorder %s2748_s4, %s2748_s4 }
 0xdc5   :  { %p2755_p1 = por %p2754_p0, %p2753_p13 }
 0xdc7   :  { %p2756_p2 = pnand %p2755_p1, %p2749_p12 }
 0xdc9   :  { %2759 = shalt.err (!%p2756_p2)
}
 0xdca   :  { %s2760_s24 = scalar_lea.hbm %s3269_s10, 512 }
 0xdcb   :  { %p2761_p3 = scmp.ne.s32.totalorder %s3269_s10, %s2760_s24  ;;  %p2764_p4 = scmp.lt.u32.totalorder %s2760_s24, %s3269_s10 }
 0xdcd   :  { %p2766_p5 = pnand %p2764_p4, %p2761_p3 }
 0xdcf   :  { %2769 = shalt.err (!%p2766_p5)
}
 0xdd0   :  { %2072 = dma.vmem_to_hbm [thread:$0]  %s3221_s14, 512, %s3269_s10, [#allocation10], %s2781_s27, %s2781_s27, %s2782_s28  }
 0xdd1   :  { %2774 = dma.done.wait [#allocation5], 512  }
 0xdd2   :  { %2775 = vsyncadd [#allocation5], 4294966784 }
 0xdd3   :  { %2776 = dma.done.wait [#allocation10], 768  }
 0xdd4   :  { %2777 = vsyncadd [#allocation10], 4294966528 }
 0xdd5   :  { %2778 = dma.done.wait [#allocation13], 1024  }
 0xdd6   :  { %2779 = vsyncadd [#allocation13], 4294966272 }
 0xdd7   :  { %2097 = vsyncpa [#allocation4], 1 }
 0xdd8   :  { %2098 = vsyncpa [#allocation7], 1 }
 0xdd9   :  { %2099 = vsyncpa [#allocation5], 1 }
 0xdda   :  { %2100 = vsyncpa [#allocation10], 1 }
 0xddb   :  { %2101 = vsyncpa [#allocation13], 1 }

</bundles_post_ra>
